<compile_context>
chip_gen: v7x
topology: tpu7x:2x2x1
jax: 0.10.0
libtpu: 0.0.40
codegen_flags: <defaults>
</compile_context>

<pallas_src>
import math
import jax
import jax.numpy as jnp
from jax.experimental import pallas as pl
from jax.experimental.pallas import tpu as pltpu

# ---------------- scaled-down GPT-2 config ----------------
VOCAB = 128
N_EMBD = 64
N_HEAD = 4
HEAD_DIM = N_EMBD // N_HEAD
N_LAYER = 2
MLP_DIM = 4 * N_EMBD
SEQ = 8
BATCH = 2
NUM_CLASSES = 4
CLS_PAD = 128            # classifier head padded to a full 128-lane store
LN_EPS = 1e-5
NEG_INF = -1e9           # f32 additive mask (single mask, no stacking)

# ---- packed-parameter slab layout ----
# w64 slab: all weights whose contraction dim is N_EMBD, lane-concatenated with
# every segment starting on a 128-lane boundary (tile-aligned static slices).
QKV_OFF = 0                         # width 3*N_EMBD = 192 (region padded to 256)
PROJ_OFF = 256                      # width N_EMBD   = 64  (region padded to 128)
FC_OFF = 384                        # width MLP_DIM  = 256
LAYER_W_LANES = 640                 # per-layer lane footprint in w64
CLS_OFF = N_LAYER * LAYER_W_LANES   # classifier head weight (padded to 128 classes)
W64_LANES = CLS_OFF + CLS_PAD       # 1408 lanes total (~360 KiB f32)

# vecs slab: every bias / LayerNorm vector is one zero-padded 256-lane row.
VEC_LANES = 256
VROWS_PER_LAYER = 8                 # ln1_g, ln1_b, bqkv, bproj, ln2_g, ln2_b, bfc, bmp
FIN_ROW = N_LAYER * VROWS_PER_LAYER
NV = FIN_ROW + 3                    # + ln_f_g, ln_f_b, b_cls
(R_LN1G, R_LN1B, R_BQKV, R_BPROJ, R_LN2G, R_LN2B, R_BFC, R_BMP) = range(8)


def _layer_norm(x, gamma, beta):
    mean = jnp.mean(x, axis=-1, keepdims=True)
    var = jnp.mean((x - mean) ** 2, axis=-1, keepdims=True)
    return (x - mean) * jax.lax.rsqrt(var + LN_EPS) * gamma + beta


def _gelu_new(x):
    # GPT-2 "gelu_new" (tanh approximation)
    return 0.5 * x * (1.0 + jnp.tanh(0.7978845608028654 * (x + 0.044715 * x * x * x)))


# ---------------- fused forward kernel ----------------
def fused_forward_kernel(h_ref, bias_ref, w64_ref, wmp_ref, vec_ref, out_ref):
    """One grid step = one sequence: N_LAYER blocks + final LN + classifier head."""
    scale = 1.0 / math.sqrt(HEAD_DIM)
    x = h_ref[...]                      # (SEQ, N_EMBD)
    bias = bias_ref[0]                  # (SEQ, SEQ) additive mask built in wrapper

    def vec(row, width):                # lane-dense (1, width) bias / LN row
        return vec_ref[row:row + 1, :width]

    for l in range(N_LAYER):
        wbase = l * LAYER_W_LANES
        vbase = l * VROWS_PER_LAYER

        # --- fused QKV projection: one (SEQ,64) @ (64,192) MXU push ---
        xn = _layer_norm(x, vec(vbase + R_LN1G, N_EMBD), vec(vbase + R_LN1B, N_EMBD))
        wqkv = w64_ref[:, wbase + QKV_OFF: wbase + QKV_OFF + 3 * N_EMBD]
        qkv = jnp.dot(xn, wqkv, preferred_element_type=jnp.float32) \
            + vec(vbase + R_BQKV, 3 * N_EMBD)                        # (SEQ, 192)
        q = qkv[:, :N_EMBD]
        kT = qkv[:, N_EMBD:2 * N_EMBD].T                             # (N_EMBD, SEQ)
        v = qkv[:, 2 * N_EMBD:3 * N_EMBD]

        # --- per-head attention core (hd=16 scores are inherent to MHA) ---
        ctx_parts = []
        for hh in range(N_HEAD):
            lo, hi = hh * HEAD_DIM, (hh + 1) * HEAD_DIM
            s = jnp.dot(q[:, lo:hi], kT[lo:hi, :],
                        preferred_element_type=jnp.float32) * scale + bias
            s = s - jnp.max(s, axis=-1, keepdims=True)
            p = jnp.exp(s)
            p = p * pl.reciprocal(jnp.sum(p, axis=-1, keepdims=True), approx=True)
            ctx_parts.append(jnp.dot(p, v[:, lo:hi],
                                     preferred_element_type=jnp.float32))
        ctx = jnp.concatenate(ctx_parts, axis=-1)                    # (SEQ, N_EMBD)

        # --- fused output projection: head-sum happens inside one (64,64) matmul ---
        wproj = w64_ref[:, wbase + PROJ_OFF: wbase + PROJ_OFF + N_EMBD]
        x = x + jnp.dot(ctx, wproj, preferred_element_type=jnp.float32) \
              + vec(vbase + R_BPROJ, N_EMBD)

        # --- MLP ---
        xn2 = _layer_norm(x, vec(vbase + R_LN2G, N_EMBD), vec(vbase + R_LN2B, N_EMBD))
        wfc = w64_ref[:, wbase + FC_OFF: wbase + FC_OFF + MLP_DIM]
        hm = _gelu_new(jnp.dot(xn2, wfc, preferred_element_type=jnp.float32)
                       + vec(vbase + R_BFC, MLP_DIM))                # (SEQ, 256)
        x = x + jnp.dot(hm, wmp_ref[l], preferred_element_type=jnp.float32) \
              + vec(vbase + R_BMP, N_EMBD)

    # --- final LayerNorm + classifier head (128 padded classes -> dense store) ---
    # Non-first tokens / padded rows produce finite garbage and are discarded by
    # the wrapper ([:, 0, :NUM_CLASSES]); computed anyway to keep the store dense.
    xf = _layer_norm(x, vec(FIN_ROW + 0, N_EMBD), vec(FIN_ROW + 1, N_EMBD))
    wcls = w64_ref[:, CLS_OFF:CLS_OFF + CLS_PAD]
    out_ref[...] = jnp.dot(xf, wcls, preferred_element_type=jnp.float32) \
                 + vec(FIN_ROW + 2, CLS_PAD)


# ---------------- full forward (SimpleTextClassifier.forward) ----------------
@jax.jit
def simple_text_classifier(input_ids, attention_mask, params):
    B, S = input_ids.shape
    # Embedding lookup (JAX glue): token + positional embeddings.
    h = params["wte"][input_ids] + params["wpe"][:S][None, :, :]     # (B, S, D)
    h = h.reshape(B * S, N_EMBD).astype(jnp.float32)

    # Additive attention bias (causal + key padding), built ONCE in the wrapper.
    row = jnp.arange(S)[:, None]
    col = jnp.arange(S)[None, :]
    allowed = (col <= row)[None, :, :] & (attention_mask > 0)[:, None, :]
    bias = jnp.where(allowed, 0.0, NEG_INF).astype(jnp.float32)      # (B, S, S)

    logits_all = pl.pallas_call(
        fused_forward_kernel,
        out_shape=jax.ShapeDtypeStruct((B * S, CLS_PAD), jnp.float32),
        grid=(B,),
        in_specs=[
            pl.BlockSpec((S, N_EMBD), lambda b: (b, 0)),             # hidden rows
            pl.BlockSpec((1, S, S), lambda b: (b, 0, 0)),            # per-seq mask
            pl.BlockSpec((N_EMBD, W64_LANES), lambda b: (0, 0)),     # weight slab
            pl.BlockSpec((N_LAYER, MLP_DIM, N_EMBD), lambda b: (0, 0, 0)),  # MLP-out
            pl.BlockSpec((NV, VEC_LANES), lambda b: (0, 0)),         # bias/LN rows
        ],
        out_specs=pl.BlockSpec((S, CLS_PAD), lambda b: (b, 0)),
        compiler_params=pltpu.CompilerParams(dimension_semantics=("parallel",)),
    )(h, bias, params["w64"], params["wmp"], params["vecs"])

    # last_hidden_state[:, 0, :] -> fc: take first token of each sequence + real classes.
    return logits_all.reshape(B, S, CLS_PAD)[:, 0, :NUM_CLASSES]


# ---------------- deterministic parameter init (packed slabs) ----------------
def init_params(key):
    std = 0.02
    keys = iter(jax.random.split(key, 64))

    def nrm(shape):
        return (std * jax.random.normal(next(keys), shape)).astype(jnp.float32)

    w64 = jnp.zeros((N_EMBD, W64_LANES), jnp.float32)
    wmp = jnp.zeros((N_LAYER, MLP_DIM, N_EMBD), jnp.float32)
    vecs = jnp.zeros((NV, VEC_LANES), jnp.float32)

    for l in range(N_LAYER):
        wbase = l * LAYER_W_LANES
        vbase = l * VROWS_PER_LAYER
        # Wqkv rows are in concatenated-head order [q_h0..q_h3 | k_h0.. | v_h0..];
        # Wproj is the standard (D, D) c_proj acting on concatenated head contexts.
        # TODO(synk): verify this row ordering if pretrained c_attn/c_proj weights
        #             ever replace the random init.
        w64 = w64.at[:, wbase + QKV_OFF: wbase + QKV_OFF + 3 * N_EMBD].set(
            nrm((N_EMBD, 3 * N_EMBD)))
        w64 = w64.at[:, wbase + PROJ_OFF: wbase + PROJ_OFF + N_EMBD].set(
            nrm((N_EMBD, N_EMBD)))
        w64 = w64.at[:, wbase + FC_OFF: wbase + FC_OFF + MLP_DIM].set(
            nrm((N_EMBD, MLP_DIM)))
        wmp = wmp.at[l].set(nrm((MLP_DIM, N_EMBD)))
        vecs = vecs.at[vbase + R_LN1G, :N_EMBD].set(1.0)   # LN gammas = 1, betas = 0
        vecs = vecs.at[vbase + R_LN2G, :N_EMBD].set(1.0)
        vecs = vecs.at[vbase + R_BQKV, :3 * N_EMBD].set(nrm((3 * N_EMBD,)))
        vecs = vecs.at[vbase + R_BPROJ, :N_EMBD].set(nrm((N_EMBD,)))
        vecs = vecs.at[vbase + R_BFC, :MLP_DIM].set(nrm((MLP_DIM,)))
        vecs = vecs.at[vbase + R_BMP, :N_EMBD].set(nrm((N_EMBD,)))

    vecs = vecs.at[FIN_ROW + 0, :N_EMBD].set(1.0)          # final LN gamma
    w64 = w64.at[:, CLS_OFF:CLS_OFF + NUM_CLASSES].set(nrm((N_EMBD, NUM_CLASSES)))
    vecs = vecs.at[FIN_ROW + 2, :NUM_CLASSES].set(nrm((NUM_CLASSES,)))

    return {
        "wte": nrm((VOCAB, N_EMBD)),
        "wpe": nrm((1024, N_EMBD))[:SEQ],
        "w64": w64,
        "wmp": wmp,
        "vecs": vecs,
    }


if __name__ == "__main__":
    key = jax.random.PRNGKey(0)
    k_ids, k_params = jax.random.split(key)

    input_ids = jax.random.randint(k_ids, (BATCH, SEQ), 0, VOCAB, dtype=jnp.int32)
    # second sequence has two padded positions at the end
    attention_mask = jnp.array(
        [[1, 1, 1, 1, 1, 1, 1, 1],
         [1, 1, 1, 1, 1, 1, 0, 0]], dtype=jnp.float32)

    params = init_params(k_params)

    logits = simple_text_classifier(input_ids, attention_mask, params)
    logits = jax.block_until_ready(logits)

    assert logits.shape == (BATCH, NUM_CLASSES)
    assert logits.dtype == jnp.float32
    assert bool(jnp.all(jnp.isfinite(logits)))
    print("KERNEL_OK")
</pallas_src>

<mosaic_0001>
module attributes {stable_mosaic.version = 11 : i64} {
  func.func @fused_forward_kernel(%arg0: i32, %arg1: memref<8x64xf32, #tpu.memory_space<vmem>>, %arg2: memref<1x8x8xf32, #tpu.memory_space<vmem>>, %arg3: memref<64x1408xf32, #tpu.memory_space<vmem>>, %arg4: memref<2x256x64xf32, #tpu.memory_space<vmem>>, %arg5: memref<19x256xf32, #tpu.memory_space<vmem>>, %arg6: memref<8x128xf32, #tpu.memory_space<vmem>>) attributes {dimension_semantics = [#tpu.dimension_semantics<parallel>], iteration_bounds = array<i64: 2>, scalar_prefetch = 0 : i64, scratch_operands = 0 : i64, tpu.core_type = #tpu.core_type<tc>, window_params = [{transform_indices = @transform_0, window_bounds = array<i64: 8, 64>}, {transform_indices = @transform_1, window_bounds = array<i64: 1, 8, 8>}, {pipeline_mode = #tpu.pipeline_mode<synchronous>, transform_indices = @transform_2, window_bounds = array<i64: 64, 1408>}, {pipeline_mode = #tpu.pipeline_mode<synchronous>, transform_indices = @transform_3, window_bounds = array<i64: 2, 256, 64>}, {pipeline_mode = #tpu.pipeline_mode<synchronous>, transform_indices = @transform_4, window_bounds = array<i64: 19, 256>}, {transform_indices = @transform_5, window_bounds = array<i64: 8, 128>}]} {
    %c0 = arith.constant 0 : index
    %c0_0 = arith.constant 0 : index
    %0 = vector.load %arg1[%c0, %c0_0] : memref<8x64xf32, #tpu.memory_space<vmem>>, vector<8x64xf32>
    %c0_1 = arith.constant 0 : index
    %c0_2 = arith.constant 0 : index
    %c0_3 = arith.constant 0 : index
    %1 = vector.load %arg2[%c0_1, %c0_2, %c0_3] : memref<1x8x8xf32, #tpu.memory_space<vmem>>, vector<1x8x8xf32>
    %2 = vector.shape_cast %1 : vector<1x8x8xf32> to vector<8x8xf32>
    %c0_4 = arith.constant 0 : index
    %c0_5 = arith.constant 0 : index
    %3 = vector.load %arg5[%c0_4, %c0_5] : memref<19x256xf32, #tpu.memory_space<vmem>>, vector<1x64xf32>
    %c1 = arith.constant 1 : index
    %c0_6 = arith.constant 0 : index
    %4 = vector.load %arg5[%c1, %c0_6] : memref<19x256xf32, #tpu.memory_space<vmem>>, vector<1x64xf32>
    %cst = arith.constant dense<0.000000e+00> : vector<8xf32>
    %5 = vector.multi_reduction <add>, %0, %cst [1] : vector<8x64xf32> to vector<8xf32>
    %6 = vector.shape_cast %5 : vector<8xf32> to vector<8x1xf32>
    %cst_7 = arith.constant 6.400000e+01 : f32
    %7 = vector.broadcast %cst_7 : f32 to vector<8x1xf32>
    %8 = arith.divf %6, %7 : vector<8x1xf32>
    %9 = vector.broadcast %8 : vector<8x1xf32> to vector<8x64xf32>
    %10 = arith.subf %0, %9 : vector<8x64xf32>
    %11 = arith.mulf %10, %10 : vector<8x64xf32>
    %cst_8 = arith.constant dense<0.000000e+00> : vector<8xf32>
    %12 = vector.multi_reduction <add>, %11, %cst_8 [1] : vector<8x64xf32> to vector<8xf32>
    %13 = vector.shape_cast %12 : vector<8xf32> to vector<8x1xf32>
    %cst_9 = arith.constant 6.400000e+01 : f32
    %14 = vector.broadcast %cst_9 : f32 to vector<8x1xf32>
    %15 = arith.divf %13, %14 : vector<8x1xf32>
    %16 = vector.broadcast %8 : vector<8x1xf32> to vector<8x64xf32>
    %17 = arith.subf %0, %16 : vector<8x64xf32>
    %cst_10 = arith.constant 9.99999974E-6 : f32
    %18 = vector.broadcast %cst_10 : f32 to vector<8x1xf32>
    %19 = arith.addf %15, %18 : vector<8x1xf32>
    %20 = math.rsqrt %19 : vector<8x1xf32>
    %21 = vector.broadcast %20 : vector<8x1xf32> to vector<8x64xf32>
    %22 = arith.mulf %17, %21 : vector<8x64xf32>
    %23 = vector.broadcast %3 : vector<1x64xf32> to vector<8x64xf32>
    %24 = arith.mulf %22, %23 : vector<8x64xf32>
    %25 = vector.broadcast %4 : vector<1x64xf32> to vector<8x64xf32>
    %26 = arith.addf %24, %25 : vector<8x64xf32>
    %c0_11 = arith.constant 0 : index
    %c0_12 = arith.constant 0 : index
    %27 = vector.load %arg3[%c0_11, %c0_12] : memref<64x1408xf32, #tpu.memory_space<vmem>>, vector<64x192xf32>
    %cst_13 = arith.constant dense<0.000000e+00> : vector<8x192xf32>
    %28 = tpu.matmul %26, %27, %cst_13 {dimension_numbers = #tpu.dot_dimension_numbers<[1], [0], [0], [1], [0, 0, 1, 1], [], []>} : vector<8x64xf32>, vector<64x192xf32>, vector<8x192xf32> -> vector<8x192xf32>
    %c2 = arith.constant 2 : index
    %c0_14 = arith.constant 0 : index
    %29 = vector.load %arg5[%c2, %c0_14] : memref<19x256xf32, #tpu.memory_space<vmem>>, vector<1x192xf32>
    %30 = vector.broadcast %29 : vector<1x192xf32> to vector<8x192xf32>
    %31 = arith.addf %28, %30 : vector<8x192xf32>
    %32 = vector.extract_strided_slice %31 {offsets = [0, 0], sizes = [8, 64], strides = [1, 1]} : vector<8x192xf32> to vector<8x64xf32>
    %33 = vector.extract_strided_slice %31 {offsets = [0, 64], sizes = [8, 64], strides = [1, 1]} : vector<8x192xf32> to vector<8x64xf32>
    %34 = tpu.transpose %33, [1, 0] : vector<8x64xf32> -> vector<64x8xf32>
    %35 = vector.extract_strided_slice %31 {offsets = [0, 128], sizes = [8, 64], strides = [1, 1]} : vector<8x192xf32> to vector<8x64xf32>
    %36 = vector.extract_strided_slice %32 {offsets = [0, 0], sizes = [8, 16], strides = [1, 1]} : vector<8x64xf32> to vector<8x16xf32>
    %37 = vector.extract_strided_slice %34 {offsets = [0, 0], sizes = [16, 8], strides = [1, 1]} : vector<64x8xf32> to vector<16x8xf32>
    %cst_15 = arith.constant dense<0.000000e+00> : vector<8x8xf32>
    %38 = tpu.matmul %36, %37, %cst_15 {dimension_numbers = #tpu.dot_dimension_numbers<[1], [0], [0], [1], [0, 0, 1, 1], [], []>} : vector<8x16xf32>, vector<16x8xf32>, vector<8x8xf32> -> vector<8x8xf32>
    %cst_16 = arith.constant 2.500000e-01 : f32
    %39 = vector.broadcast %cst_16 : f32 to vector<8x8xf32>
    %40 = arith.mulf %38, %39 : vector<8x8xf32>
    %41 = arith.addf %40, %2 : vector<8x8xf32>
    %cst_17 = arith.constant dense<0xFF800000> : vector<8xf32>
    %42 = vector.multi_reduction <maximumf>, %41, %cst_17 [1] : vector<8x8xf32> to vector<8xf32>
    %43 = vector.shape_cast %42 : vector<8xf32> to vector<8x1xf32>
    %44 = vector.broadcast %43 : vector<8x1xf32> to vector<8x8xf32>
    %45 = arith.subf %41, %44 : vector<8x8xf32>
    %46 = math.exp %45 : vector<8x8xf32>
    %cst_18 = arith.constant dense<0.000000e+00> : vector<8xf32>
    %47 = vector.multi_reduction <add>, %46, %cst_18 [1] : vector<8x8xf32> to vector<8xf32>
    %48 = vector.shape_cast %47 : vector<8xf32> to vector<8x1xf32>
    %49 = tpu.reciprocal %48 {approx = true} : vector<8x1xf32> -> vector<8x1xf32>
    %50 = vector.broadcast %49 : vector<8x1xf32> to vector<8x8xf32>
    %51 = arith.mulf %46, %50 : vector<8x8xf32>
    %52 = vector.extract_strided_slice %35 {offsets = [0, 0], sizes = [8, 16], strides = [1, 1]} : vector<8x64xf32> to vector<8x16xf32>
    %cst_19 = arith.constant dense<0.000000e+00> : vector<8x16xf32>
    %53 = tpu.matmul %51, %52, %cst_19 {dimension_numbers = #tpu.dot_dimension_numbers<[1], [0], [0], [1], [0, 0, 1, 1], [], []>} : vector<8x8xf32>, vector<8x16xf32>, vector<8x16xf32> -> vector<8x16xf32>
    %54 = vector.extract_strided_slice %32 {offsets = [0, 16], sizes = [8, 16], strides = [1, 1]} : vector<8x64xf32> to vector<8x16xf32>
    %55 = vector.extract_strided_slice %34 {offsets = [16, 0], sizes = [16, 8], strides = [1, 1]} : vector<64x8xf32> to vector<16x8xf32>
    %cst_20 = arith.constant dense<0.000000e+00> : vector<8x8xf32>
    %56 = tpu.matmul %54, %55, %cst_20 {dimension_numbers = #tpu.dot_dimension_numbers<[1], [0], [0], [1], [0, 0, 1, 1], [], []>} : vector<8x16xf32>, vector<16x8xf32>, vector<8x8xf32> -> vector<8x8xf32>
    %cst_21 = arith.constant 2.500000e-01 : f32
    %57 = vector.broadcast %cst_21 : f32 to vector<8x8xf32>
    %58 = arith.mulf %56, %57 : vector<8x8xf32>
    %59 = arith.addf %58, %2 : vector<8x8xf32>
    %cst_22 = arith.constant dense<0xFF800000> : vector<8xf32>
    %60 = vector.multi_reduction <maximumf>, %59, %cst_22 [1] : vector<8x8xf32> to vector<8xf32>
    %61 = vector.shape_cast %60 : vector<8xf32> to vector<8x1xf32>
    %62 = vector.broadcast %61 : vector<8x1xf32> to vector<8x8xf32>
    %63 = arith.subf %59, %62 : vector<8x8xf32>
    %64 = math.exp %63 : vector<8x8xf32>
    %cst_23 = arith.constant dense<0.000000e+00> : vector<8xf32>
    %65 = vector.multi_reduction <add>, %64, %cst_23 [1] : vector<8x8xf32> to vector<8xf32>
    %66 = vector.shape_cast %65 : vector<8xf32> to vector<8x1xf32>
    %67 = tpu.reciprocal %66 {approx = true} : vector<8x1xf32> -> vector<8x1xf32>
    %68 = vector.broadcast %67 : vector<8x1xf32> to vector<8x8xf32>
    %69 = arith.mulf %64, %68 : vector<8x8xf32>
    %70 = vector.extract_strided_slice %35 {offsets = [0, 16], sizes = [8, 16], strides = [1, 1]} : vector<8x64xf32> to vector<8x16xf32>
    %cst_24 = arith.constant dense<0.000000e+00> : vector<8x16xf32>
    %71 = tpu.matmul %69, %70, %cst_24 {dimension_numbers = #tpu.dot_dimension_numbers<[1], [0], [0], [1], [0, 0, 1, 1], [], []>} : vector<8x8xf32>, vector<8x16xf32>, vector<8x16xf32> -> vector<8x16xf32>
    %72 = vector.extract_strided_slice %32 {offsets = [0, 32], sizes = [8, 16], strides = [1, 1]} : vector<8x64xf32> to vector<8x16xf32>
    %73 = vector.extract_strided_slice %34 {offsets = [32, 0], sizes = [16, 8], strides = [1, 1]} : vector<64x8xf32> to vector<16x8xf32>
    %cst_25 = arith.constant dense<0.000000e+00> : vector<8x8xf32>
    %74 = tpu.matmul %72, %73, %cst_25 {dimension_numbers = #tpu.dot_dimension_numbers<[1], [0], [0], [1], [0, 0, 1, 1], [], []>} : vector<8x16xf32>, vector<16x8xf32>, vector<8x8xf32> -> vector<8x8xf32>
    %cst_26 = arith.constant 2.500000e-01 : f32
    %75 = vector.broadcast %cst_26 : f32 to vector<8x8xf32>
    %76 = arith.mulf %74, %75 : vector<8x8xf32>
    %77 = arith.addf %76, %2 : vector<8x8xf32>
    %cst_27 = arith.constant dense<0xFF800000> : vector<8xf32>
    %78 = vector.multi_reduction <maximumf>, %77, %cst_27 [1] : vector<8x8xf32> to vector<8xf32>
    %79 = vector.shape_cast %78 : vector<8xf32> to vector<8x1xf32>
    %80 = vector.broadcast %79 : vector<8x1xf32> to vector<8x8xf32>
    %81 = arith.subf %77, %80 : vector<8x8xf32>
    %82 = math.exp %81 : vector<8x8xf32>
    %cst_28 = arith.constant dense<0.000000e+00> : vector<8xf32>
    %83 = vector.multi_reduction <add>, %82, %cst_28 [1] : vector<8x8xf32> to vector<8xf32>
    %84 = vector.shape_cast %83 : vector<8xf32> to vector<8x1xf32>
    %85 = tpu.reciprocal %84 {approx = true} : vector<8x1xf32> -> vector<8x1xf32>
    %86 = vector.broadcast %85 : vector<8x1xf32> to vector<8x8xf32>
    %87 = arith.mulf %82, %86 : vector<8x8xf32>
    %88 = vector.extract_strided_slice %35 {offsets = [0, 32], sizes = [8, 16], strides = [1, 1]} : vector<8x64xf32> to vector<8x16xf32>
    %cst_29 = arith.constant dense<0.000000e+00> : vector<8x16xf32>
    %89 = tpu.matmul %87, %88, %cst_29 {dimension_numbers = #tpu.dot_dimension_numbers<[1], [0], [0], [1], [0, 0, 1, 1], [], []>} : vector<8x8xf32>, vector<8x16xf32>, vector<8x16xf32> -> vector<8x16xf32>
    %90 = vector.extract_strided_slice %32 {offsets = [0, 48], sizes = [8, 16], strides = [1, 1]} : vector<8x64xf32> to vector<8x16xf32>
    %91 = vector.extract_strided_slice %34 {offsets = [48, 0], sizes = [16, 8], strides = [1, 1]} : vector<64x8xf32> to vector<16x8xf32>
    %cst_30 = arith.constant dense<0.000000e+00> : vector<8x8xf32>
    %92 = tpu.matmul %90, %91, %cst_30 {dimension_numbers = #tpu.dot_dimension_numbers<[1], [0], [0], [1], [0, 0, 1, 1], [], []>} : vector<8x16xf32>, vector<16x8xf32>, vector<8x8xf32> -> vector<8x8xf32>
    %cst_31 = arith.constant 2.500000e-01 : f32
    %93 = vector.broadcast %cst_31 : f32 to vector<8x8xf32>
    %94 = arith.mulf %92, %93 : vector<8x8xf32>
    %95 = arith.addf %94, %2 : vector<8x8xf32>
    %cst_32 = arith.constant dense<0xFF800000> : vector<8xf32>
    %96 = vector.multi_reduction <maximumf>, %95, %cst_32 [1] : vector<8x8xf32> to vector<8xf32>
    %97 = vector.shape_cast %96 : vector<8xf32> to vector<8x1xf32>
    %98 = vector.broadcast %97 : vector<8x1xf32> to vector<8x8xf32>
    %99 = arith.subf %95, %98 : vector<8x8xf32>
    %100 = math.exp %99 : vector<8x8xf32>
    %cst_33 = arith.constant dense<0.000000e+00> : vector<8xf32>
    %101 = vector.multi_reduction <add>, %100, %cst_33 [1] : vector<8x8xf32> to vector<8xf32>
    %102 = vector.shape_cast %101 : vector<8xf32> to vector<8x1xf32>
    %103 = tpu.reciprocal %102 {approx = true} : vector<8x1xf32> -> vector<8x1xf32>
    %104 = vector.broadcast %103 : vector<8x1xf32> to vector<8x8xf32>
    %105 = arith.mulf %100, %104 : vector<8x8xf32>
    %106 = vector.extract_strided_slice %35 {offsets = [0, 48], sizes = [8, 16], strides = [1, 1]} : vector<8x64xf32> to vector<8x16xf32>
    %cst_34 = arith.constant dense<0.000000e+00> : vector<8x16xf32>
    %107 = tpu.matmul %105, %106, %cst_34 {dimension_numbers = #tpu.dot_dimension_numbers<[1], [0], [0], [1], [0, 0, 1, 1], [], []>} : vector<8x8xf32>, vector<8x16xf32>, vector<8x16xf32> -> vector<8x16xf32>
    %108 = tpu.concatenate %53, %71, %89, %107 in 1 : vector<8x16xf32>, vector<8x16xf32>, vector<8x16xf32>, vector<8x16xf32> -> vector<8x64xf32>
    %c0_35 = arith.constant 0 : index
    %c256 = arith.constant 256 : index
    %109 = vector.load %arg3[%c0_35, %c256] : memref<64x1408xf32, #tpu.memory_space<vmem>>, vector<64x64xf32>
    %cst_36 = arith.constant dense<0.000000e+00> : vector<8x64xf32>
    %110 = tpu.matmul %108, %109, %cst_36 {dimension_numbers = #tpu.dot_dimension_numbers<[1], [0], [0], [1], [0, 0, 1, 1], [], []>} : vector<8x64xf32>, vector<64x64xf32>, vector<8x64xf32> -> vector<8x64xf32>
    %111 = arith.addf %0, %110 : vector<8x64xf32>
    %c3 = arith.constant 3 : index
    %c0_37 = arith.constant 0 : index
    %112 = vector.load %arg5[%c3, %c0_37] : memref<19x256xf32, #tpu.memory_space<vmem>>, vector<1x64xf32>
    %113 = vector.broadcast %112 : vector<1x64xf32> to vector<8x64xf32>
    %114 = arith.addf %111, %113 : vector<8x64xf32>
    %c4 = arith.constant 4 : index
    %c0_38 = arith.constant 0 : index
    %115 = vector.load %arg5[%c4, %c0_38] : memref<19x256xf32, #tpu.memory_space<vmem>>, vector<1x64xf32>
    %c5 = arith.constant 5 : index
    %c0_39 = arith.constant 0 : index
    %116 = vector.load %arg5[%c5, %c0_39] : memref<19x256xf32, #tpu.memory_space<vmem>>, vector<1x64xf32>
    %cst_40 = arith.constant dense<0.000000e+00> : vector<8xf32>
    %117 = vector.multi_reduction <add>, %114, %cst_40 [1] : vector<8x64xf32> to vector<8xf32>
    %118 = vector.shape_cast %117 : vector<8xf32> to vector<8x1xf32>
    %cst_41 = arith.constant 6.400000e+01 : f32
    %119 = vector.broadcast %cst_41 : f32 to vector<8x1xf32>
    %120 = arith.divf %118, %119 : vector<8x1xf32>
    %121 = vector.broadcast %120 : vector<8x1xf32> to vector<8x64xf32>
    %122 = arith.subf %114, %121 : vector<8x64xf32>
    %123 = arith.mulf %122, %122 : vector<8x64xf32>
    %cst_42 = arith.constant dense<0.000000e+00> : vector<8xf32>
    %124 = vector.multi_reduction <add>, %123, %cst_42 [1] : vector<8x64xf32> to vector<8xf32>
    %125 = vector.shape_cast %124 : vector<8xf32> to vector<8x1xf32>
    %cst_43 = arith.constant 6.400000e+01 : f32
    %126 = vector.broadcast %cst_43 : f32 to vector<8x1xf32>
    %127 = arith.divf %125, %126 : vector<8x1xf32>
    %128 = vector.broadcast %120 : vector<8x1xf32> to vector<8x64xf32>
    %129 = arith.subf %114, %128 : vector<8x64xf32>
    %cst_44 = arith.constant 9.99999974E-6 : f32
    %130 = vector.broadcast %cst_44 : f32 to vector<8x1xf32>
    %131 = arith.addf %127, %130 : vector<8x1xf32>
    %132 = math.rsqrt %131 : vector<8x1xf32>
    %133 = vector.broadcast %132 : vector<8x1xf32> to vector<8x64xf32>
    %134 = arith.mulf %129, %133 : vector<8x64xf32>
    %135 = vector.broadcast %115 : vector<1x64xf32> to vector<8x64xf32>
    %136 = arith.mulf %134, %135 : vector<8x64xf32>
    %137 = vector.broadcast %116 : vector<1x64xf32> to vector<8x64xf32>
    %138 = arith.addf %136, %137 : vector<8x64xf32>
    %c0_45 = arith.constant 0 : index
    %c384 = arith.constant 384 : index
    %139 = vector.load %arg3[%c0_45, %c384] : memref<64x1408xf32, #tpu.memory_space<vmem>>, vector<64x256xf32>
    %cst_46 = arith.constant dense<0.000000e+00> : vector<8x256xf32>
    %140 = tpu.matmul %138, %139, %cst_46 {dimension_numbers = #tpu.dot_dimension_numbers<[1], [0], [0], [1], [0, 0, 1, 1], [], []>} : vector<8x64xf32>, vector<64x256xf32>, vector<8x256xf32> -> vector<8x256xf32>
    %c6 = arith.constant 6 : index
    %c0_47 = arith.constant 0 : index
    %141 = vector.load %arg5[%c6, %c0_47] : memref<19x256xf32, #tpu.memory_space<vmem>>, vector<1x256xf32>
    %142 = vector.broadcast %141 : vector<1x256xf32> to vector<8x256xf32>
    %143 = arith.addf %140, %142 : vector<8x256xf32>
    %cst_48 = arith.constant 5.000000e-01 : f32
    %144 = vector.broadcast %cst_48 : f32 to vector<8x256xf32>
    %145 = arith.mulf %144, %143 : vector<8x256xf32>
    %cst_49 = arith.constant 4.471500e-02 : f32
    %146 = vector.broadcast %cst_49 : f32 to vector<8x256xf32>
    %147 = arith.mulf %146, %143 : vector<8x256xf32>
    %148 = arith.mulf %147, %143 : vector<8x256xf32>
    %149 = arith.mulf %148, %143 : vector<8x256xf32>
    %150 = arith.addf %143, %149 : vector<8x256xf32>
    %cst_50 = arith.constant 0.797884583 : f32
    %151 = vector.broadcast %cst_50 : f32 to vector<8x256xf32>
    %152 = arith.mulf %151, %150 : vector<8x256xf32>
    %153 = math.tanh %152 : vector<8x256xf32>
    %cst_51 = arith.constant 1.000000e+00 : f32
    %154 = vector.broadcast %cst_51 : f32 to vector<8x256xf32>
    %155 = arith.addf %154, %153 : vector<8x256xf32>
    %156 = arith.mulf %145, %155 : vector<8x256xf32>
    %c0_52 = arith.constant 0 : index
    %c0_53 = arith.constant 0 : index
    %c0_54 = arith.constant 0 : index
    %157 = vector.load %arg4[%c0_52, %c0_53, %c0_54] : memref<2x256x64xf32, #tpu.memory_space<vmem>>, vector<1x256x64xf32>
    %158 = vector.shape_cast %157 : vector<1x256x64xf32> to vector<256x64xf32>
    %cst_55 = arith.constant dense<0.000000e+00> : vector<8x64xf32>
    %159 = tpu.matmul %156, %158, %cst_55 {dimension_numbers = #tpu.dot_dimension_numbers<[1], [0], [0], [1], [0, 0, 1, 1], [], []>} : vector<8x256xf32>, vector<256x64xf32>, vector<8x64xf32> -> vector<8x64xf32>
    %160 = arith.addf %114, %159 : vector<8x64xf32>
    %c7 = arith.constant 7 : index
    %c0_56 = arith.constant 0 : index
    %161 = vector.load %arg5[%c7, %c0_56] : memref<19x256xf32, #tpu.memory_space<vmem>>, vector<1x64xf32>
    %162 = vector.broadcast %161 : vector<1x64xf32> to vector<8x64xf32>
    %163 = arith.addf %160, %162 : vector<8x64xf32>
    %c8 = arith.constant 8 : index
    %c0_57 = arith.constant 0 : index
    %164 = vector.load %arg5[%c8, %c0_57] : memref<19x256xf32, #tpu.memory_space<vmem>>, vector<1x64xf32>
    %c9 = arith.constant 9 : index
    %c0_58 = arith.constant 0 : index
    %165 = vector.load %arg5[%c9, %c0_58] : memref<19x256xf32, #tpu.memory_space<vmem>>, vector<1x64xf32>
    %cst_59 = arith.constant dense<0.000000e+00> : vector<8xf32>
    %166 = vector.multi_reduction <add>, %163, %cst_59 [1] : vector<8x64xf32> to vector<8xf32>
    %167 = vector.shape_cast %166 : vector<8xf32> to vector<8x1xf32>
    %cst_60 = arith.constant 6.400000e+01 : f32
    %168 = vector.broadcast %cst_60 : f32 to vector<8x1xf32>
    %169 = arith.divf %167, %168 : vector<8x1xf32>
    %170 = vector.broadcast %169 : vector<8x1xf32> to vector<8x64xf32>
    %171 = arith.subf %163, %170 : vector<8x64xf32>
    %172 = arith.mulf %171, %171 : vector<8x64xf32>
    %cst_61 = arith.constant dense<0.000000e+00> : vector<8xf32>
    %173 = vector.multi_reduction <add>, %172, %cst_61 [1] : vector<8x64xf32> to vector<8xf32>
    %174 = vector.shape_cast %173 : vector<8xf32> to vector<8x1xf32>
    %cst_62 = arith.constant 6.400000e+01 : f32
    %175 = vector.broadcast %cst_62 : f32 to vector<8x1xf32>
    %176 = arith.divf %174, %175 : vector<8x1xf32>
    %177 = vector.broadcast %169 : vector<8x1xf32> to vector<8x64xf32>
    %178 = arith.subf %163, %177 : vector<8x64xf32>
    %cst_63 = arith.constant 9.99999974E-6 : f32
    %179 = vector.broadcast %cst_63 : f32 to vector<8x1xf32>
    %180 = arith.addf %176, %179 : vector<8x1xf32>
    %181 = math.rsqrt %180 : vector<8x1xf32>
    %182 = vector.broadcast %181 : vector<8x1xf32> to vector<8x64xf32>
    %183 = arith.mulf %178, %182 : vector<8x64xf32>
    %184 = vector.broadcast %164 : vector<1x64xf32> to vector<8x64xf32>
    %185 = arith.mulf %183, %184 : vector<8x64xf32>
    %186 = vector.broadcast %165 : vector<1x64xf32> to vector<8x64xf32>
    %187 = arith.addf %185, %186 : vector<8x64xf32>
    %c0_64 = arith.constant 0 : index
    %c640 = arith.constant 640 : index
    %188 = vector.load %arg3[%c0_64, %c640] : memref<64x1408xf32, #tpu.memory_space<vmem>>, vector<64x192xf32>
    %cst_65 = arith.constant dense<0.000000e+00> : vector<8x192xf32>
    %189 = tpu.matmul %187, %188, %cst_65 {dimension_numbers = #tpu.dot_dimension_numbers<[1], [0], [0], [1], [0, 0, 1, 1], [], []>} : vector<8x64xf32>, vector<64x192xf32>, vector<8x192xf32> -> vector<8x192xf32>
    %c10 = arith.constant 10 : index
    %c0_66 = arith.constant 0 : index
    %190 = vector.load %arg5[%c10, %c0_66] : memref<19x256xf32, #tpu.memory_space<vmem>>, vector<1x192xf32>
    %191 = vector.broadcast %190 : vector<1x192xf32> to vector<8x192xf32>
    %192 = arith.addf %189, %191 : vector<8x192xf32>
    %193 = vector.extract_strided_slice %192 {offsets = [0, 0], sizes = [8, 64], strides = [1, 1]} : vector<8x192xf32> to vector<8x64xf32>
    %194 = vector.extract_strided_slice %192 {offsets = [0, 64], sizes = [8, 64], strides = [1, 1]} : vector<8x192xf32> to vector<8x64xf32>
    %195 = tpu.transpose %194, [1, 0] : vector<8x64xf32> -> vector<64x8xf32>
    %196 = vector.extract_strided_slice %192 {offsets = [0, 128], sizes = [8, 64], strides = [1, 1]} : vector<8x192xf32> to vector<8x64xf32>
    %197 = vector.extract_strided_slice %193 {offsets = [0, 0], sizes = [8, 16], strides = [1, 1]} : vector<8x64xf32> to vector<8x16xf32>
    %198 = vector.extract_strided_slice %195 {offsets = [0, 0], sizes = [16, 8], strides = [1, 1]} : vector<64x8xf32> to vector<16x8xf32>
    %cst_67 = arith.constant dense<0.000000e+00> : vector<8x8xf32>
    %199 = tpu.matmul %197, %198, %cst_67 {dimension_numbers = #tpu.dot_dimension_numbers<[1], [0], [0], [1], [0, 0, 1, 1], [], []>} : vector<8x16xf32>, vector<16x8xf32>, vector<8x8xf32> -> vector<8x8xf32>
    %cst_68 = arith.constant 2.500000e-01 : f32
    %200 = vector.broadcast %cst_68 : f32 to vector<8x8xf32>
    %201 = arith.mulf %199, %200 : vector<8x8xf32>
    %202 = arith.addf %201, %2 : vector<8x8xf32>
    %cst_69 = arith.constant dense<0xFF800000> : vector<8xf32>
    %203 = vector.multi_reduction <maximumf>, %202, %cst_69 [1] : vector<8x8xf32> to vector<8xf32>
    %204 = vector.shape_cast %203 : vector<8xf32> to vector<8x1xf32>
    %205 = vector.broadcast %204 : vector<8x1xf32> to vector<8x8xf32>
    %206 = arith.subf %202, %205 : vector<8x8xf32>
    %207 = math.exp %206 : vector<8x8xf32>
    %cst_70 = arith.constant dense<0.000000e+00> : vector<8xf32>
    %208 = vector.multi_reduction <add>, %207, %cst_70 [1] : vector<8x8xf32> to vector<8xf32>
    %209 = vector.shape_cast %208 : vector<8xf32> to vector<8x1xf32>
    %210 = tpu.reciprocal %209 {approx = true} : vector<8x1xf32> -> vector<8x1xf32>
    %211 = vector.broadcast %210 : vector<8x1xf32> to vector<8x8xf32>
    %212 = arith.mulf %207, %211 : vector<8x8xf32>
    %213 = vector.extract_strided_slice %196 {offsets = [0, 0], sizes = [8, 16], strides = [1, 1]} : vector<8x64xf32> to vector<8x16xf32>
    %cst_71 = arith.constant dense<0.000000e+00> : vector<8x16xf32>
    %214 = tpu.matmul %212, %213, %cst_71 {dimension_numbers = #tpu.dot_dimension_numbers<[1], [0], [0], [1], [0, 0, 1, 1], [], []>} : vector<8x8xf32>, vector<8x16xf32>, vector<8x16xf32> -> vector<8x16xf32>
    %215 = vector.extract_strided_slice %193 {offsets = [0, 16], sizes = [8, 16], strides = [1, 1]} : vector<8x64xf32> to vector<8x16xf32>
    %216 = vector.extract_strided_slice %195 {offsets = [16, 0], sizes = [16, 8], strides = [1, 1]} : vector<64x8xf32> to vector<16x8xf32>
    %cst_72 = arith.constant dense<0.000000e+00> : vector<8x8xf32>
    %217 = tpu.matmul %215, %216, %cst_72 {dimension_numbers = #tpu.dot_dimension_numbers<[1], [0], [0], [1], [0, 0, 1, 1], [], []>} : vector<8x16xf32>, vector<16x8xf32>, vector<8x8xf32> -> vector<8x8xf32>
    %cst_73 = arith.constant 2.500000e-01 : f32
    %218 = vector.broadcast %cst_73 : f32 to vector<8x8xf32>
    %219 = arith.mulf %217, %218 : vector<8x8xf32>
    %220 = arith.addf %219, %2 : vector<8x8xf32>
    %cst_74 = arith.constant dense<0xFF800000> : vector<8xf32>
    %221 = vector.multi_reduction <maximumf>, %220, %cst_74 [1] : vector<8x8xf32> to vector<8xf32>
    %222 = vector.shape_cast %221 : vector<8xf32> to vector<8x1xf32>
    %223 = vector.broadcast %222 : vector<8x1xf32> to vector<8x8xf32>
    %224 = arith.subf %220, %223 : vector<8x8xf32>
    %225 = math.exp %224 : vector<8x8xf32>
    %cst_75 = arith.constant dense<0.000000e+00> : vector<8xf32>
    %226 = vector.multi_reduction <add>, %225, %cst_75 [1] : vector<8x8xf32> to vector<8xf32>
    %227 = vector.shape_cast %226 : vector<8xf32> to vector<8x1xf32>
    %228 = tpu.reciprocal %227 {approx = true} : vector<8x1xf32> -> vector<8x1xf32>
    %229 = vector.broadcast %228 : vector<8x1xf32> to vector<8x8xf32>
    %230 = arith.mulf %225, %229 : vector<8x8xf32>
    %231 = vector.extract_strided_slice %196 {offsets = [0, 16], sizes = [8, 16], strides = [1, 1]} : vector<8x64xf32> to vector<8x16xf32>
    %cst_76 = arith.constant dense<0.000000e+00> : vector<8x16xf32>
    %232 = tpu.matmul %230, %231, %cst_76 {dimension_numbers = #tpu.dot_dimension_numbers<[1], [0], [0], [1], [0, 0, 1, 1], [], []>} : vector<8x8xf32>, vector<8x16xf32>, vector<8x16xf32> -> vector<8x16xf32>
    %233 = vector.extract_strided_slice %193 {offsets = [0, 32], sizes = [8, 16], strides = [1, 1]} : vector<8x64xf32> to vector<8x16xf32>
    %234 = vector.extract_strided_slice %195 {offsets = [32, 0], sizes = [16, 8], strides = [1, 1]} : vector<64x8xf32> to vector<16x8xf32>
    %cst_77 = arith.constant dense<0.000000e+00> : vector<8x8xf32>
    %235 = tpu.matmul %233, %234, %cst_77 {dimension_numbers = #tpu.dot_dimension_numbers<[1], [0], [0], [1], [0, 0, 1, 1], [], []>} : vector<8x16xf32>, vector<16x8xf32>, vector<8x8xf32> -> vector<8x8xf32>
    %cst_78 = arith.constant 2.500000e-01 : f32
    %236 = vector.broadcast %cst_78 : f32 to vector<8x8xf32>
    %237 = arith.mulf %235, %236 : vector<8x8xf32>
    %238 = arith.addf %237, %2 : vector<8x8xf32>
    %cst_79 = arith.constant dense<0xFF800000> : vector<8xf32>
    %239 = vector.multi_reduction <maximumf>, %238, %cst_79 [1] : vector<8x8xf32> to vector<8xf32>
    %240 = vector.shape_cast %239 : vector<8xf32> to vector<8x1xf32>
    %241 = vector.broadcast %240 : vector<8x1xf32> to vector<8x8xf32>
    %242 = arith.subf %238, %241 : vector<8x8xf32>
    %243 = math.exp %242 : vector<8x8xf32>
    %cst_80 = arith.constant dense<0.000000e+00> : vector<8xf32>
    %244 = vector.multi_reduction <add>, %243, %cst_80 [1] : vector<8x8xf32> to vector<8xf32>
    %245 = vector.shape_cast %244 : vector<8xf32> to vector<8x1xf32>
    %246 = tpu.reciprocal %245 {approx = true} : vector<8x1xf32> -> vector<8x1xf32>
    %247 = vector.broadcast %246 : vector<8x1xf32> to vector<8x8xf32>
    %248 = arith.mulf %243, %247 : vector<8x8xf32>
    %249 = vector.extract_strided_slice %196 {offsets = [0, 32], sizes = [8, 16], strides = [1, 1]} : vector<8x64xf32> to vector<8x16xf32>
    %cst_81 = arith.constant dense<0.000000e+00> : vector<8x16xf32>
    %250 = tpu.matmul %248, %249, %cst_81 {dimension_numbers = #tpu.dot_dimension_numbers<[1], [0], [0], [1], [0, 0, 1, 1], [], []>} : vector<8x8xf32>, vector<8x16xf32>, vector<8x16xf32> -> vector<8x16xf32>
    %251 = vector.extract_strided_slice %193 {offsets = [0, 48], sizes = [8, 16], strides = [1, 1]} : vector<8x64xf32> to vector<8x16xf32>
    %252 = vector.extract_strided_slice %195 {offsets = [48, 0], sizes = [16, 8], strides = [1, 1]} : vector<64x8xf32> to vector<16x8xf32>
    %cst_82 = arith.constant dense<0.000000e+00> : vector<8x8xf32>
    %253 = tpu.matmul %251, %252, %cst_82 {dimension_numbers = #tpu.dot_dimension_numbers<[1], [0], [0], [1], [0, 0, 1, 1], [], []>} : vector<8x16xf32>, vector<16x8xf32>, vector<8x8xf32> -> vector<8x8xf32>
    %cst_83 = arith.constant 2.500000e-01 : f32
    %254 = vector.broadcast %cst_83 : f32 to vector<8x8xf32>
    %255 = arith.mulf %253, %254 : vector<8x8xf32>
    %256 = arith.addf %255, %2 : vector<8x8xf32>
    %cst_84 = arith.constant dense<0xFF800000> : vector<8xf32>
    %257 = vector.multi_reduction <maximumf>, %256, %cst_84 [1] : vector<8x8xf32> to vector<8xf32>
    %258 = vector.shape_cast %257 : vector<8xf32> to vector<8x1xf32>
    %259 = vector.broadcast %258 : vector<8x1xf32> to vector<8x8xf32>
    %260 = arith.subf %256, %259 : vector<8x8xf32>
    %261 = math.exp %260 : vector<8x8xf32>
    %cst_85 = arith.constant dense<0.000000e+00> : vector<8xf32>
    %262 = vector.multi_reduction <add>, %261, %cst_85 [1] : vector<8x8xf32> to vector<8xf32>
    %263 = vector.shape_cast %262 : vector<8xf32> to vector<8x1xf32>
    %264 = tpu.reciprocal %263 {approx = true} : vector<8x1xf32> -> vector<8x1xf32>
    %265 = vector.broadcast %264 : vector<8x1xf32> to vector<8x8xf32>
    %266 = arith.mulf %261, %265 : vector<8x8xf32>
    %267 = vector.extract_strided_slice %196 {offsets = [0, 48], sizes = [8, 16], strides = [1, 1]} : vector<8x64xf32> to vector<8x16xf32>
    %cst_86 = arith.constant dense<0.000000e+00> : vector<8x16xf32>
    %268 = tpu.matmul %266, %267, %cst_86 {dimension_numbers = #tpu.dot_dimension_numbers<[1], [0], [0], [1], [0, 0, 1, 1], [], []>} : vector<8x8xf32>, vector<8x16xf32>, vector<8x16xf32> -> vector<8x16xf32>
    %269 = tpu.concatenate %214, %232, %250, %268 in 1 : vector<8x16xf32>, vector<8x16xf32>, vector<8x16xf32>, vector<8x16xf32> -> vector<8x64xf32>
    %c0_87 = arith.constant 0 : index
    %c896 = arith.constant 896 : index
    %270 = vector.load %arg3[%c0_87, %c896] : memref<64x1408xf32, #tpu.memory_space<vmem>>, vector<64x64xf32>
    %cst_88 = arith.constant dense<0.000000e+00> : vector<8x64xf32>
    %271 = tpu.matmul %269, %270, %cst_88 {dimension_numbers = #tpu.dot_dimension_numbers<[1], [0], [0], [1], [0, 0, 1, 1], [], []>} : vector<8x64xf32>, vector<64x64xf32>, vector<8x64xf32> -> vector<8x64xf32>
    %272 = arith.addf %163, %271 : vector<8x64xf32>
    %c11 = arith.constant 11 : index
    %c0_89 = arith.constant 0 : index
    %273 = vector.load %arg5[%c11, %c0_89] : memref<19x256xf32, #tpu.memory_space<vmem>>, vector<1x64xf32>
    %274 = vector.broadcast %273 : vector<1x64xf32> to vector<8x64xf32>
    %275 = arith.addf %272, %274 : vector<8x64xf32>
    %c12 = arith.constant 12 : index
    %c0_90 = arith.constant 0 : index
    %276 = vector.load %arg5[%c12, %c0_90] : memref<19x256xf32, #tpu.memory_space<vmem>>, vector<1x64xf32>
    %c13 = arith.constant 13 : index
    %c0_91 = arith.constant 0 : index
    %277 = vector.load %arg5[%c13, %c0_91] : memref<19x256xf32, #tpu.memory_space<vmem>>, vector<1x64xf32>
    %cst_92 = arith.constant dense<0.000000e+00> : vector<8xf32>
    %278 = vector.multi_reduction <add>, %275, %cst_92 [1] : vector<8x64xf32> to vector<8xf32>
    %279 = vector.shape_cast %278 : vector<8xf32> to vector<8x1xf32>
    %cst_93 = arith.constant 6.400000e+01 : f32
    %280 = vector.broadcast %cst_93 : f32 to vector<8x1xf32>
    %281 = arith.divf %279, %280 : vector<8x1xf32>
    %282 = vector.broadcast %281 : vector<8x1xf32> to vector<8x64xf32>
    %283 = arith.subf %275, %282 : vector<8x64xf32>
    %284 = arith.mulf %283, %283 : vector<8x64xf32>
    %cst_94 = arith.constant dense<0.000000e+00> : vector<8xf32>
    %285 = vector.multi_reduction <add>, %284, %cst_94 [1] : vector<8x64xf32> to vector<8xf32>
    %286 = vector.shape_cast %285 : vector<8xf32> to vector<8x1xf32>
    %cst_95 = arith.constant 6.400000e+01 : f32
    %287 = vector.broadcast %cst_95 : f32 to vector<8x1xf32>
    %288 = arith.divf %286, %287 : vector<8x1xf32>
    %289 = vector.broadcast %281 : vector<8x1xf32> to vector<8x64xf32>
    %290 = arith.subf %275, %289 : vector<8x64xf32>
    %cst_96 = arith.constant 9.99999974E-6 : f32
    %291 = vector.broadcast %cst_96 : f32 to vector<8x1xf32>
    %292 = arith.addf %288, %291 : vector<8x1xf32>
    %293 = math.rsqrt %292 : vector<8x1xf32>
    %294 = vector.broadcast %293 : vector<8x1xf32> to vector<8x64xf32>
    %295 = arith.mulf %290, %294 : vector<8x64xf32>
    %296 = vector.broadcast %276 : vector<1x64xf32> to vector<8x64xf32>
    %297 = arith.mulf %295, %296 : vector<8x64xf32>
    %298 = vector.broadcast %277 : vector<1x64xf32> to vector<8x64xf32>
    %299 = arith.addf %297, %298 : vector<8x64xf32>
    %c0_97 = arith.constant 0 : index
    %c1024 = arith.constant 1024 : index
    %300 = vector.load %arg3[%c0_97, %c1024] : memref<64x1408xf32, #tpu.memory_space<vmem>>, vector<64x256xf32>
    %cst_98 = arith.constant dense<0.000000e+00> : vector<8x256xf32>
    %301 = tpu.matmul %299, %300, %cst_98 {dimension_numbers = #tpu.dot_dimension_numbers<[1], [0], [0], [1], [0, 0, 1, 1], [], []>} : vector<8x64xf32>, vector<64x256xf32>, vector<8x256xf32> -> vector<8x256xf32>
    %c14 = arith.constant 14 : index
    %c0_99 = arith.constant 0 : index
    %302 = vector.load %arg5[%c14, %c0_99] : memref<19x256xf32, #tpu.memory_space<vmem>>, vector<1x256xf32>
    %303 = vector.broadcast %302 : vector<1x256xf32> to vector<8x256xf32>
    %304 = arith.addf %301, %303 : vector<8x256xf32>
    %cst_100 = arith.constant 5.000000e-01 : f32
    %305 = vector.broadcast %cst_100 : f32 to vector<8x256xf32>
    %306 = arith.mulf %305, %304 : vector<8x256xf32>
    %cst_101 = arith.constant 4.471500e-02 : f32
    %307 = vector.broadcast %cst_101 : f32 to vector<8x256xf32>
    %308 = arith.mulf %307, %304 : vector<8x256xf32>
    %309 = arith.mulf %308, %304 : vector<8x256xf32>
    %310 = arith.mulf %309, %304 : vector<8x256xf32>
    %311 = arith.addf %304, %310 : vector<8x256xf32>
    %cst_102 = arith.constant 0.797884583 : f32
    %312 = vector.broadcast %cst_102 : f32 to vector<8x256xf32>
    %313 = arith.mulf %312, %311 : vector<8x256xf32>
    %314 = math.tanh %313 : vector<8x256xf32>
    %cst_103 = arith.constant 1.000000e+00 : f32
    %315 = vector.broadcast %cst_103 : f32 to vector<8x256xf32>
    %316 = arith.addf %315, %314 : vector<8x256xf32>
    %317 = arith.mulf %306, %316 : vector<8x256xf32>
    %c1_104 = arith.constant 1 : index
    %c0_105 = arith.constant 0 : index
    %c0_106 = arith.constant 0 : index
    %318 = vector.load %arg4[%c1_104, %c0_105, %c0_106] : memref<2x256x64xf32, #tpu.memory_space<vmem>>, vector<1x256x64xf32>
    %319 = vector.shape_cast %318 : vector<1x256x64xf32> to vector<256x64xf32>
    %cst_107 = arith.constant dense<0.000000e+00> : vector<8x64xf32>
    %320 = tpu.matmul %317, %319, %cst_107 {dimension_numbers = #tpu.dot_dimension_numbers<[1], [0], [0], [1], [0, 0, 1, 1], [], []>} : vector<8x256xf32>, vector<256x64xf32>, vector<8x64xf32> -> vector<8x64xf32>
    %321 = arith.addf %275, %320 : vector<8x64xf32>
    %c15 = arith.constant 15 : index
    %c0_108 = arith.constant 0 : index
    %322 = vector.load %arg5[%c15, %c0_108] : memref<19x256xf32, #tpu.memory_space<vmem>>, vector<1x64xf32>
    %323 = vector.broadcast %322 : vector<1x64xf32> to vector<8x64xf32>
    %324 = arith.addf %321, %323 : vector<8x64xf32>
    %c16 = arith.constant 16 : index
    %c0_109 = arith.constant 0 : index
    %325 = vector.load %arg5[%c16, %c0_109] : memref<19x256xf32, #tpu.memory_space<vmem>>, vector<1x64xf32>
    %c17 = arith.constant 17 : index
    %c0_110 = arith.constant 0 : index
    %326 = vector.load %arg5[%c17, %c0_110] : memref<19x256xf32, #tpu.memory_space<vmem>>, vector<1x64xf32>
    %cst_111 = arith.constant dense<0.000000e+00> : vector<8xf32>
    %327 = vector.multi_reduction <add>, %324, %cst_111 [1] : vector<8x64xf32> to vector<8xf32>
    %328 = vector.shape_cast %327 : vector<8xf32> to vector<8x1xf32>
    %cst_112 = arith.constant 6.400000e+01 : f32
    %329 = vector.broadcast %cst_112 : f32 to vector<8x1xf32>
    %330 = arith.divf %328, %329 : vector<8x1xf32>
    %331 = vector.broadcast %330 : vector<8x1xf32> to vector<8x64xf32>
    %332 = arith.subf %324, %331 : vector<8x64xf32>
    %333 = arith.mulf %332, %332 : vector<8x64xf32>
    %cst_113 = arith.constant dense<0.000000e+00> : vector<8xf32>
    %334 = vector.multi_reduction <add>, %333, %cst_113 [1] : vector<8x64xf32> to vector<8xf32>
    %335 = vector.shape_cast %334 : vector<8xf32> to vector<8x1xf32>
    %cst_114 = arith.constant 6.400000e+01 : f32
    %336 = vector.broadcast %cst_114 : f32 to vector<8x1xf32>
    %337 = arith.divf %335, %336 : vector<8x1xf32>
    %338 = vector.broadcast %330 : vector<8x1xf32> to vector<8x64xf32>
    %339 = arith.subf %324, %338 : vector<8x64xf32>
    %cst_115 = arith.constant 9.99999974E-6 : f32
    %340 = vector.broadcast %cst_115 : f32 to vector<8x1xf32>
    %341 = arith.addf %337, %340 : vector<8x1xf32>
    %342 = math.rsqrt %341 : vector<8x1xf32>
    %343 = vector.broadcast %342 : vector<8x1xf32> to vector<8x64xf32>
    %344 = arith.mulf %339, %343 : vector<8x64xf32>
    %345 = vector.broadcast %325 : vector<1x64xf32> to vector<8x64xf32>
    %346 = arith.mulf %344, %345 : vector<8x64xf32>
    %347 = vector.broadcast %326 : vector<1x64xf32> to vector<8x64xf32>
    %348 = arith.addf %346, %347 : vector<8x64xf32>
    %c0_116 = arith.constant 0 : index
    %c1280 = arith.constant 1280 : index
    %349 = vector.load %arg3[%c0_116, %c1280] : memref<64x1408xf32, #tpu.memory_space<vmem>>, vector<64x128xf32>
    %cst_117 = arith.constant dense<0.000000e+00> : vector<8x128xf32>
    %350 = tpu.matmul %348, %349, %cst_117 {dimension_numbers = #tpu.dot_dimension_numbers<[1], [0], [0], [1], [0, 0, 1, 1], [], []>} : vector<8x64xf32>, vector<64x128xf32>, vector<8x128xf32> -> vector<8x128xf32>
    %c18 = arith.constant 18 : index
    %c0_118 = arith.constant 0 : index
    %351 = vector.load %arg5[%c18, %c0_118] : memref<19x256xf32, #tpu.memory_space<vmem>>, vector<1x128xf32>
    %352 = vector.broadcast %351 : vector<1x128xf32> to vector<8x128xf32>
    %353 = arith.addf %350, %352 : vector<8x128xf32>
    %c0_119 = arith.constant 0 : index
    %c0_120 = arith.constant 0 : index
    %354 = vector.load %arg6[%c0_119, %c0_120] : memref<8x128xf32, #tpu.memory_space<vmem>>, vector<8x128xf32>
    tpu.vector_store %arg6[%c0_119, %c0_120], %353 {strides = array<i32>} : memref<8x128xf32, #tpu.memory_space<vmem>>, vector<8x128xf32>,
    return
  }
  func.func @transform_0(%arg0: i32) -> (i32, i32) {
    %c0_i32 = arith.constant 0 : i32
    %c0_i32_0 = arith.constant 0 : i32
    return %arg0, %c0_i32 : i32, i32
  }
  func.func @transform_1(%arg0: i32) -> (i32, i32, i32) {
    %c0_i32 = arith.constant 0 : i32
    %c0_i32_0 = arith.constant 0 : i32
    %c0_i32_1 = arith.constant 0 : i32
    return %arg0, %c0_i32, %c0_i32_0 : i32, i32, i32
  }
  func.func @transform_2(%arg0: i32) -> (i32, i32) {
    %c0_i32 = arith.constant 0 : i32
    %c0_i32_0 = arith.constant 0 : i32
    %c0_i32_1 = arith.constant 0 : i32
    return %c0_i32, %c0_i32_0 : i32, i32
  }
  func.func @transform_3(%arg0: i32) -> (i32, i32, i32) {
    %c0_i32 = arith.constant 0 : i32
    %c0_i32_0 = arith.constant 0 : i32
    %c0_i32_1 = arith.constant 0 : i32
    %c0_i32_2 = arith.constant 0 : i32
    return %c0_i32, %c0_i32_0, %c0_i32_1 : i32, i32, i32
  }
  func.func @transform_4(%arg0: i32) -> (i32, i32) {
    %c0_i32 = arith.constant 0 : i32
    %c0_i32_0 = arith.constant 0 : i32
    %c0_i32_1 = arith.constant 0 : i32
    return %c0_i32, %c0_i32_0 : i32, i32
  }
  func.func @transform_5(%arg0: i32) -> (i32, i32) {
    %c0_i32 = arith.constant 0 : i32
    %c0_i32_0 = arith.constant 0 : i32
    return %arg0, %c0_i32 : i32, i32
  }
}

</mosaic_0001>

<bundles_post_ra>
// kernel: simple_text_classifier.1
= control target key start
LH: loop header
LB: loop body
LE: loop exit
PB: predicated region body
PF: predicated region fallthrough
CT: control target
= control target key end

     0   :  { %s3288_s18 = smov 0   ;;  %s4055_s0 = inlined_call_operand.vmem [shape: f32[16,64], index: 0, kind: input, shape index: {}]   ;;  %s4056_s1 = inlined_call_operand.vmem [shape: f32[2,8,8], index: 1, kind: input, shape index: {}]   ;;  %s4057_s2 = inlined_call_operand.vmem [shape: f32[64,1408], index: 2, kind: input, shape index: {}]   ;;  %s4058_s3 = inlined_call_operand.vmem [shape: f32[2,256,64], index: 3, kind: input, shape index: {}]   ;;  %s4059_s4 = inlined_call_operand.vmem [shape: f32[19,256], index: 4, kind: input, shape index: {}]   ;;  %s4060_s5 = inlined_call_operand.vmem [shape: f32[16,128], index: 5, kind: output, shape index: {}]  }
   0x1 LB: > { %s2665_s19 = sadd.s32 4294967295, %s3246_s18   ;;  %p2669_p0 = scmp.ge.s32.totalorder %s3246_s18, 1  ;;  %s3246_s18 = sphi %s3288_s18, %s15_s18  }
   0x2   : > { %p195_p1 = scmp.lt.s32.totalorder %s3246_s18, 3 }
   0x4   : > { %p196_p2 = pnand %p2669_p0, %p195_p1 }
   0x5   : > { %p225_p3 = scmp.lt.s32.totalorder (!%p196_p2), %s2665_s19, 1  ;;  %vm241_vm0 = vcmask (!%p196_p2), 523264   ;;  %v259_v7 = vld [vmem:[%s4057_s2 + $0x8] sm:$0xff] (!%p196_p2)  ;;  %v261_v8 = vld [vmem:[%s4057_s2 + $0x60] sm:$0xff] (!%p196_p2)  ;;  %v260_v11 = vld [vmem:[%s4057_s2 + $0x58] sm:$0xff] (!%p196_p2)  ;;  %v3248_v20 = vmov (!%p196_p2), 0.0   ;;  %v277_v41 = vlaneseq (!%p196_p2) }
   0x6   : > { %199 = sbr.rel (%p196_p2) target bundleno = 7673 (0x1df9), region = 40  ;;  %v3008_v9 = vpack.c.bf16 (!%p196_p2), %v261_v8, %v259_v7  ;;  %v258_v10 = vld [vmem:[%s4057_s2] sm:$0xff] (!%p196_p2)  ;;  %v263_v13 = vld [vmem:[%s4057_s2 + $0xb8] sm:$0xff] (!%p196_p2)  ;;  %v265_v14 = vld [vmem:[%s4057_s2 + $0x110] sm:$0xff] (!%p196_p2)  ;;  %354 = vmatprep.mubr.f32.mxu0 (!%p196_p2), %v3248_v20  ;;  %2871 = vmatprep.subr.mxu1 (!%p196_p2), %v3248_v20  ;;  %vm3249_vm1 = vmmov (!%p196_p2), 0   ;;  %s3250_s14 = smov (!%p196_p2), 48  }
   0x7   : > { %v3010_v12 = vpack.c.bf16 (!%p196_p2), %v260_v11, %v258_v10  ;;  %v262_v15 = vld [vmem:[%s4057_s2 + $0xb0] sm:$0xff] (!%p196_p2)  ;;  %v3012_v16 = vpack.c.bf16 (!%p196_p2), %v265_v14, %v263_v13  ;;  %v264_v17 = vld [vmem:[%s4057_s2 + $0x108] sm:$0xff] (!%p196_p2)  ;;  %v269_v19 = vld [vmem:[%s4057_s2 + $0x1c0] sm:$0xff] (!%p196_p2)  ;;  %v278_v42 = vshrl.u32 (!%p196_p2), %v277_v41, 7  ;;  %2873 = vmatprep.mubr.msk.f32.mxu1 (!%p196_p2), %vm3249_vm1, %v3248_v20  ;;  %s3251_s15 = smov (!%p196_p2), 64   ;;  %vm364_vm2 = vcmask (!%p196_p2), 130048  }
   0x8   : > { %3009 = vmatprep.subr.bf16.mxu0 (!%p196_p2), %v3008_v9  ;;  %v267_v18 = vld [vmem:[%s4057_s2 + $0x168] sm:$0xff] (!%p196_p2)  ;;  %v3014_v21 = vpack.c.bf16 (!%p196_p2), %v264_v17, %v262_v15  ;;  %v266_v23 = vld [vmem:[%s4057_s2 + $0x160] sm:$0xff] (!%p196_p2)  ;;  %v268_v24 = vld [vmem:[%s4057_s2 + $0x1b8] sm:$0xff] (!%p196_p2)  ;;  %vm441_vm3 = vcmask (!%p196_p2), 64512   ;;  %s3252_s21 = smov (!%p196_p2), 112   ;;  %s3253_s22 = smov (!%p196_p2), 32  }
   0x9   : > { %3011 = vmatpush1.bf16.msra.mxu0 (!%p196_p2), %v3010_v12  ;;  %v3016_v22 = vpack.c.bf16 (!%p196_p2), %v269_v19, %v267_v18  ;;  %v271_v25 = vld [vmem:[%s4057_s2 + $0x218] sm:$0xff] (!%p196_p2)  ;;  %v273_v26 = vld [vmem:[%s4057_s2 + $0x270] sm:$0xff] (!%p196_p2)  ;;  %v3018_v27 = vpack.c.bf16 (!%p196_p2), %v268_v24, %v266_v23  ;;  %v272_v30 = vld [vmem:[%s4057_s2 + $0x268] sm:$0xff] (!%p196_p2)  ;;  %v3369_v43 = vsub.s32 (!%p196_p2), 0, %v278_v42  ;;  %v3381_v49 = vsub.s32 (!%p196_p2), 1, %v278_v42  ;;  %s3255_s24 = smov (!%p196_p2), 16  }
   0xa   : > { %3013 = vmatprep.subr.bf16.mxu0 (!%p196_p2), %v3012_v16  ;;  %v3020_v28 = vpack.c.bf16 (!%p196_p2), %v273_v26, %v271_v25  ;;  %v270_v29 = vld [vmem:[%s4057_s2 + $0x210] sm:$0xff] (!%p196_p2)  ;;  %v239_v36 = vld [vmem:[%s4059_s4] ss:$0 sm:$0xff] (!%p196_p2)  ;;  %v240_v38 = vld [vmem:[%s4059_s4 + $0x1] ss:$0 sm:$0xff] (!%p196_p2)  ;;  %s3256_s25 = smov (!%p196_p2), 80  }
   0xb   : > { %v3022_v31 = vpack.c.bf16 (!%p196_p2), %v272_v30, %v270_v29  ;;  %v2673_v44 = vld [vmem:[%s4059_s4 + $0x2] ss:$8 sm:$0x3] (!%p196_p2)  ;;  %vm1041_vm4 = vcmask (!%p196_p2), 261120   ;;  %vm1043_vm5 = vcmask (!%p196_p2), 392192  }
   0xc   : > { %v280_v45 = vrot.slane (!%p196_p2), %v2673_v44, %v3369_v43  ;;  %v284_v50 = vrot.slane (!%p196_p2), %v2673_v44, %v3381_v49 }
   0xd   : > { %s4062_s19 = smov (!%p225_p3, %s2665_s19), 1  ;;  %3015 = vmatpush1.bf16.msra.mxu0 %v3014_v21 }
   0xe   : > { %s3296_s20 = sshll.u32 %s4062_s19, 3  ;;  %3017 = vmatprep.subr.bf16.mxu0 %v3016_v22 }
   0xf   : > { %s228_s23 = scalar_lea.vmem %s4055_s0, %s3296_s20  ;;  %s232_s19 = scalar_lea.vmem %s4056_s1, %s3296_s20 }
  0x10   : > { %v3302_v0 = vld [vmem:[%s228_s23] sm:$0xff]  ;;  %s3254_s23 = smov 96   ;;  %s236_s30 = scalar_lea.vmem %s4060_s5, %s3296_s20 }
  0x11   : > { %v242_v1 = vsel %vm241_vm0, %v3302_v0, 0.0  ;;  %3019 = vmatpush1.bf16.msra.mxu0 %v3018_v27  ;;  %v3398_v53 = vld [vmem:[%s232_s19] sm:$0xff] }
  0x12   : > { %243 = vadd.xlane.f32.xlu0 %v242_v1  ;;  %3021 = vmatprep.subr.bf16.mxu0 %v3020_v28 }
  0x15   : > { %3023 = vmatpush1.bf16.msra.mxu0 %v3022_v31 }
  0x9f   : > { %v244_v2 = vpop.xlane.xlu0 %243 }
  0xa0   : > { %v246_v3 = vmul.f32 0.015625, %v244_v2 }
  0xa2   : > { %v247_v4 = vsub.f32 %v3302_v0, %v246_v3 }
  0xa4   : > { %v248_v5 = vmul.f32 %v247_v4, %v247_v4 }
  0xa6   : > { %v249_v6 = vsel %vm241_vm0, %v248_v5, 0.0 }
  0xa7   : > { %250 = vadd.xlane.f32.xlu0 %v249_v6 }
 0x134   : > { %v251_v32 = vpop.xlane.xlu0 %250 }
 0x135   : > { %v252_v33 = vmul.f32 0.015625, %v251_v32 }
 0x137   : > { %v253_v34 = vadd.f32 1e-05, %v252_v33 }
 0x139   : > { %3190 = vrsqrt.f32 %v253_v34 }
 0x143   : > { %v3191_v35 = vpop.eup %3190 }
 0x144   : > { %v255_v37 = vmul.f32 %v3191_v35, %v247_v4 }
 0x146   : > { %v256_v39 = vmul.f32 %v255_v37, %v239_v36 }
 0x148   : > { %v257_v40 = vadd.f32 %v256_v39, %v240_v38 }
 0x14a   : > { %2674 = vmatmul.mubr.msk.f32.vlgmr.msra.gmra.mrb[0].mxu0 %vm241_vm0, %v257_v40 }
 0x14b   : > { %2927 = vmatprep.mubr.msk.f32.mxu0 %vm3249_vm1, %v3248_v20 }
 0x21d   : > { %v356_v46 = vpop.f32.mrb[0].mxu0 }
 0x21e   : > { %v3375_v47 = vadd.f32 %v356_v46, %v280_v45  ;;  %v358_v48 = vpop.f32.mrb[1].mxu0 }
 0x21f   : > { %v3386_v52 = vadd.f32 %v358_v48, %v284_v50 }
 0x220   : > { %528 = vrot.lane.b32.xlu0 %v3375_v47, %s3250_s14  ;;  %362 = vrot.lane.b32.xlu1 %v3375_v47, %s3251_s15 }
 0x292   : > { %v363_v51 = vpop.permute.xlu1 %362  ;;  %v529_v1 = vpop.permute.xlu0 %528 }
 0x293   : > { %2872 = vmatpush3.xpose.msk.msra.mxu1 %vm364_vm2, %v363_v51 }
 0x294   : > { %2876 = vmatprep.subr.mxu1 %v3248_v20 }
 0x296   : > { %2874 = vmatmul.mubr.msk.f32.vlgmr.msra.gmra.mrb[0].mxu1 %vm364_vm2, %v3375_v47 }
 0x297   : > { %2877 = vmatpush3.msra.mxu1 %v3386_v52  ;;  %2878 = vmatprep.mubr.msk.f32.mxu1 %vm3249_vm1, %v3248_v20 }
 0x298   : > { %2881 = vmatprep.subr.mxu1 %v3248_v20 }
 0x369   : > { %v435_v54 = vpop.f32.mrb[0].mxu1 }
 0x36a   : > { %v439_v55 = vmul.f32 0.25, %v435_v54  ;;  %v2875_v56 = vpop.f32.mrb[1].mxu1 }
 0x36c   : > { %v440_v57 = vadd.f32 %v439_v55, %v3398_v53 }
 0x36e   : > { %v442_v58 = vsel %vm441_vm3, %v440_v57, -inf }
 0x36f   : > { %443 = vmax.xlane.f32.xlu1 %v442_v58 }
 0x380   : > { %618 = vrot.lane.b32.xlu1 %v3386_v52, %s3252_s21 }
 0x384   : > { %696 = vrot.lane.b32.xlu1 %v3375_v47, %s3253_s22 }
 0x3fc   : > { %v444_v59 = vpop.xlane.xlu1 %443 }
 0x3fd   : > { %v445_v60 = vsub.f32 %v440_v57, %v444_v59 }
 0x3ff   : > { %v446_v61 = vmul.f32 1.442695, %v445_v60 }
 0x400   : > { %v619_v6 = vpop.permute.xlu1 %618 }
 0x401   : > { %3192 = vpow2.f32 %v446_v61 }
 0x404   : > { %v697_v19 = vpop.permute.xlu1 %696 }
 0x40b   : > { %v3193_v62 = vpop.eup %3192 }
 0x40c   : > { %v448_v63 = vsel %vm441_vm3, %v3193_v62, 0.0 }
 0x40d   : > { %449 = vadd.xlane.f32.xlu0 %v448_v63  ;;  %v1045_v63 = vld [vmem:[%s4057_s2 + $0x10] sm:$0xff] }
 0x423   : > { %526 = vrot.lane.b32.xlu0 %v3375_v47, %s3252_s21 }
 0x49a   : > { %v450_v2 = vpop.xlane.xlu0 %449 }
 0x49b   : > { %3194 = vrcp.f32 %v450_v2  ;;  %v3257_v2 = vmov 0.0|0.0  }
 0x49c   : > { %3024 = vmatprep.subr.bf16.mxu0 %v3257_v2 }
 0x49e   : > { %v527_v5 = vpop.permute.xlu0 %526 }
 0x4a5   : > { %v3195_v3 = vpop.eup %3194 }
 0x4a6   : > { %v452_v4 = vmul.f32 %v3195_v3, %v3193_v62 }
 0x4a8   : > { %2879 = vmatmul.mubr.msk.f32.vlgmr.msra.gmra.mrb[2].mxu1 %vm441_vm3, %v452_v4  ;;  %v1048_v4 = vld [vmem:[%s4057_s2 + $0x118] sm:$0xff] }
 0x4a9   : > { %2882 = vmatpush3.xpose.msk.msra.mxu1 %vm364_vm2, %v529_v1  ;;  %2883 = vmatprep.mubr.msk.f32.mxu1 %vm3249_vm1, %v3248_v20  ;;  %v1047_v1 = vld [vmem:[%s4057_s2 + $0xc0] sm:$0xff] }
 0x4aa   : > { %2886 = vmatprep.subr.mxu1 %v3248_v20 }
 0x4ac   : > { %2884 = vmatmul.mubr.msk.f32.vlgmr.msra.gmra.mrb[4].mxu1 %vm364_vm2, %v527_v5  ;;  %v3028_v5 = vpack.c.bf16 %v1048_v4, %v1047_v1 }
 0x4ad   : > { %2887 = vmatpush3.msra.mxu1 %v619_v6  ;;  %2888 = vmatprep.mubr.msk.f32.mxu1 %vm3249_vm1, %v3248_v20  ;;  %v1049_v6 = vld [vmem:[%s4057_s2 + $0x170] sm:$0xff] }
 0x4ae   : > { %2891 = vmatprep.subr.mxu1 %v3248_v20 }
 0x57b   : > { %v3418_v7 = vpop.f32.mrb[2].mxu1 }
 0x57c   : > { %v2880_v8 = vpop.f32.mrb[3].mxu1 }
 0x57d   : > { %v1050_v8 = vld [vmem:[%s4057_s2 + $0x1c8] sm:$0xff] }
 0x57f   : > { %v600_v9 = vpop.f32.mrb[4].mxu1 }
 0x580   : > { %v604_v10 = vmul.f32 0.25, %v600_v9  ;;  %v2885_v11 = vpop.f32.mrb[5].mxu1  ;;  %v3031_v9 = vpack.c.bf16 %v1050_v8, %v1049_v6  ;;  %v1129_v6 = vld [vmem:[%s4059_s4 + $0x4] ss:$0 sm:$0xff] }
 0x581   : > { %v1052_v11 = vld [vmem:[%s4057_s2 + $0x278] sm:$0xff] }
 0x582   : > { %v605_v12 = vadd.f32 %v604_v10, %v3398_v53  ;;  %v1051_v10 = vld [vmem:[%s4057_s2 + $0x220] sm:$0xff] }
 0x584   : > { %v606_v13 = vsel %vm441_vm3, %v605_v12, -inf }
 0x585   : > { %607 = vmax.xlane.f32.xlu0 %v606_v13 }
 0x612   : > { %v608_v14 = vpop.xlane.xlu0 %607 }
 0x613   : > { %v609_v15 = vsub.f32 %v605_v12, %v608_v14  ;;  %v3034_v12 = vpack.c.bf16 %v1052_v11, %v1051_v10 }
 0x615   : > { %v610_v16 = vmul.f32 1.442695, %v609_v15 }
 0x617   : > { %3196 = vpow2.f32 %v610_v16 }
 0x621   : > { %v3197_v17 = vpop.eup %3196 }
 0x622   : > { %v612_v18 = vsel %vm441_vm3, %v3197_v17, 0.0 }
 0x623   : > { %613 = vadd.xlane.f32.xlu1 %v612_v18 }
 0x634   : > { %694 = vrot.lane.b32.xlu1 %v3375_v47, %s3254_s23 }
 0x6b0   : > { %v614_v21 = vpop.xlane.xlu1 %613 }
 0x6b1   : > { %3198 = vrcp.f32 %v614_v21 }
 0x6b4   : > { %v695_v24 = vpop.permute.xlu1 %694 }
 0x6bb   : > { %v3199_v22 = vpop.eup %3198 }
 0x6bc   : > { %v616_v23 = vmul.f32 %v3199_v22, %v3197_v17 }
 0x6be   : > { %2889 = vmatmul.mubr.msk.f32.vlgmr.msra.gmra.mrb[6].mxu1 %vm441_vm3, %v616_v23  ;;  %v1127_v23 = vld [vmem:[%s4059_s4 + $0x3] ss:$0 sm:$0xff] }
 0x6bf   : > { %2892 = vmatpush3.xpose.msk.msra.mxu1 %vm364_vm2, %v697_v19  ;;  %2893 = vmatprep.mubr.msk.f32.mxu1 %vm3249_vm1, %v3248_v20 }
 0x6c0   : > { %2896 = vmatprep.subr.mxu1 %v3248_v20 }
 0x6c2   : > { %2894 = vmatmul.mubr.msk.f32.vlgmr.msra.gmra.mrb[8].mxu1 %vm364_vm2, %v695_v24 }
 0x6c3   : > { %2898 = vmatprep.mubr.msk.f32.mxu1 %vm3249_vm1, %v3248_v20 }
 0x791   : > { %v690_v25 = vpop.f32.mrb[6].mxu1 }
 0x792   : > { %v2890_v26 = vpop.f32.mrb[7].mxu1 }
 0x795   : > { %v768_v27 = vpop.f32.mrb[8].mxu1 }
 0x796   : > { %v772_v28 = vmul.f32 0.25, %v768_v27  ;;  %v2895_v29 = vpop.f32.mrb[9].mxu1 }
 0x798   : > { %v773_v30 = vadd.f32 %v772_v28, %v3398_v53 }
 0x79a   : > { %v774_v31 = vsel %vm441_vm3, %v773_v30, -inf }
 0x79b   : > { %775 = vmax.xlane.f32.xlu0 %v774_v31 }
 0x7b1   : > { %785 = vrot.lane.b32.xlu0 %v3386_v52, %s3254_s23 }
 0x7b5   : > { %863 = vrot.lane.b32.xlu0 %v3375_v47, %s3255_s24 }
 0x7b9   : > { %861 = vrot.lane.b32.xlu0 %v3375_v47, %s3256_s25 }
 0x828   : > { %v776_v32 = vpop.xlane.xlu0 %775 }
 0x829   : > { %v777_v33 = vsub.f32 %v773_v30, %v776_v32  ;;  %v1147_v32 = vld [vmem:[%s4057_s2 + $0x20] sm:$0xff] }
 0x82b   : > { %v778_v34 = vmul.f32 1.442695, %v777_v33 }
 0x82c   : > { %v786_v35 = vpop.permute.xlu0 %785 }
 0x82d   : > { %3200 = vpow2.f32 %v778_v34  ;;  %2897 = vmatpush3.msra.mxu1 %v786_v35  ;;  %v1146_v34 = vld [vmem:[%s4057_s2 + $0x18] sm:$0xff]  ;;  %v1148_v35 = vld [vmem:[%s4057_s2 + $0x70] sm:$0xff] }
 0x82e   : > { %2901 = vmatprep.subr.mxu1 %v3248_v20 }
 0x830   : > { %v864_v40 = vpop.permute.xlu0 %863 }
 0x834   : > { %v862_v42 = vpop.permute.xlu0 %861 }
 0x837   : > { %v3201_v36 = vpop.eup %3200 }
 0x838   : > { %v780_v37 = vsel %vm441_vm3, %v3201_v36, 0.0 }
 0x839   : > { %781 = vadd.xlane.f32.xlu1 %v780_v37  ;;  %v1151_v37 = vld [vmem:[%s4057_s2 + $0xd0] sm:$0xff] }
 0x8c6   : > { %v782_v38 = vpop.xlane.xlu1 %781 }
 0x8c7   : > { %3202 = vrcp.f32 %v782_v38  ;;  %v1153_v38 = vld [vmem:[%s4057_s2 + $0x128] sm:$0xff] }
 0x8d1   : > { %v3203_v39 = vpop.eup %3202 }
 0x8d2   : > { %v784_v41 = vmul.f32 %v3203_v39, %v3201_v36  ;;  %v3038_v36 = vpack.c.bf16 %v1148_v35, %v1146_v34  ;;  %v3040_v39 = vpack.c.bf16 %v1153_v38, %v1151_v37  ;;  %v1293_v35 = vld [vmem:[%s4058_s3 + $0xd0] sm:$0xff] }
 0x8d4   : > { %2899 = vmatmul.mubr.msk.f32.vlgmr.msra.gmra.mrb[10].mxu1 %vm441_vm3, %v784_v41  ;;  %v1152_v41 = vld [vmem:[%s4057_s2 + $0x120] sm:$0xff] }
 0x8d5   : > { %2902 = vmatpush3.xpose.msk.msra.mxu1 %vm364_vm2, %v864_v40  ;;  %2903 = vmatprep.mubr.msk.f32.mxu1 %vm3249_vm1, %v3248_v20  ;;  %v1150_v40 = vld [vmem:[%s4057_s2 + $0xc8] sm:$0xff] }
 0x8d6   : > { %2906 = vmatprep.subr.mxu1 %v3248_v20 }
 0x8d8   : > { %2904 = vmatmul.mubr.msk.f32.vlgmr.msra.gmra.mrb[12].mxu1 %vm364_vm2, %v862_v42  ;;  %v3042_v42 = vpack.c.bf16 %v1152_v41, %v1150_v40  ;;  %v1278_v40 = vld [vmem:[%s4058_s3 + $0x58] sm:$0xff]  ;;  %v1295_v41 = vld [vmem:[%s4058_s3 + $0xe0] sm:$0xff] }
 0x8d9   : > { %2908 = vmatprep.mubr.msk.f32.mxu1 %vm3249_vm1, %v3248_v20 }
 0x9a7   : > { %v857_v44 = vpop.f32.mrb[10].mxu1 }
 0x9a8   : > { %v2900_v45 = vpop.f32.mrb[11].mxu1 }
 0x9a9   : > { %v1157_v45 = vld [vmem:[%s4057_s2 + $0x1d8] sm:$0xff] }
 0x9ab   : > { %v935_v46 = vpop.f32.mrb[12].mxu1 }
 0x9ac   : > { %v939_v47 = vmul.f32 0.25, %v935_v46  ;;  %v2905_v48 = vpop.f32.mrb[13].mxu1 }
 0x9ad   : > { %v1156_v48 = vld [vmem:[%s4057_s2 + $0x1d0] sm:$0xff] }
 0x9ae   : > { %v940_v50 = vadd.f32 %v939_v47, %v3398_v53  ;;  %v1154_v47 = vld [vmem:[%s4057_s2 + $0x178] sm:$0xff] }
 0x9b0   : > { %v941_v51 = vsel %vm441_vm3, %v940_v50, -inf }
 0x9b1   : > { %942 = vmax.xlane.f32.xlu0 %v941_v51  ;;  %v1159_v51 = vld [vmem:[%s4057_s2 + $0x230] sm:$0xff] }
 0xa3e   : > { %v943_v54 = vpop.xlane.xlu0 %942 }
 0xa3f   : > { %v944_v55 = vsub.f32 %v940_v50, %v943_v54  ;;  %v3046_v50 = vpack.c.bf16 %v1156_v48, %v1154_v47  ;;  %v1161_v54 = vld [vmem:[%s4057_s2 + $0x288] sm:$0xff]  ;;  %v1297_v48 = vld [vmem:[%s4058_s3 + $0xf0] sm:$0xff] }
 0xa40   : > { %v1280_v47 = vld [vmem:[%s4058_s3 + $0x68] sm:$0xff] }
 0xa41   : > { %v945_v56 = vmul.f32 1.442695, %v944_v55  ;;  %v1158_v55 = vld [vmem:[%s4057_s2 + $0x228] sm:$0xff] }
 0xa43   : > { %3204 = vpow2.f32 %v945_v56  ;;  %v3048_v56 = vpack.c.bf16 %v1161_v54, %v1159_v51 }
 0xa4d   : > { %v3205_v57 = vpop.eup %3204 }
 0xa4e   : > { %v947_v58 = vsel %vm441_vm3, %v3205_v57, 0.0 }
 0xa4f   : > { %948 = vadd.xlane.f32.xlu1 %v947_v58 }
 0xa60   : > { %952 = vrot.lane.b32.xlu1 %v3386_v52, %s3256_s25  ;;  %v1046_v52 = vld [vmem:[%s4057_s2 + $0x68] sm:$0xff] }
 0xa61   : > { %v3025_v3 = vpack.c.bf16 %v1046_v52, %v1045_v63  ;;  %v1268_v63 = vld [vmem:[%s4058_s3 + $0x8] sm:$0xff] }
 0xa63   : > { %3026 = vmatpush3.bf16.msra.mxu0 %v3025_v3 }
 0xa64   : > { %1029 = vrot.lane.b32.xlu1 %v690_v25, %s3255_s24  ;;  %3027 = vmatprep.subr.bf16.mxu0 %v3257_v2 }
 0xa67   : > { %3029 = vmatpush3.bf16.msra.mxu0 %v3028_v5 }
 0xa68   : > { %1033 = vrot.lane.b32.xlu1 %v857_v44, %s3253_s22  ;;  %3030 = vmatprep.subr.bf16.mxu0 %v3257_v2  ;;  %v1155_v44 = vld [vmem:[%s4057_s2 + $0x180] sm:$0xff] }
 0xa69   : > { %v3044_v46 = vpack.c.bf16 %v1157_v45, %v1155_v44 }
 0xa6b   : > { %3032 = vmatpush3.bf16.msra.mxu0 %v3031_v9  ;;  %v1130_v9 = vld [vmem:[%s4059_s4 + $0x5] ss:$0 sm:$0xff] }
 0xa6c   : > { %3033 = vmatprep.subr.bf16.mxu0 %v3257_v2 }
 0xa6f   : > { %3035 = vmatpush3.bf16.msra.mxu0 %v3034_v12  ;;  %v1285_v12 = vld [vmem:[%s4058_s3 + $0x90] sm:$0xff] }
 0xadc   : > { %v949_v59 = vpop.xlane.xlu1 %948 }
 0xadd   : > { %3206 = vrcp.f32 %v949_v59  ;;  %v1283_v59 = vld [vmem:[%s4058_s3 + $0x80] sm:$0xff] }
 0xae0   : > { %v953_v60 = vpop.permute.xlu1 %952 }
 0xae1   : > { %2907 = vmatpush3.msra.mxu1 %v953_v60  ;;  %v1284_v60 = vld [vmem:[%s4058_s3 + $0x88] sm:$0xff] }
 0xae4   : > { %v1030_v15 = vpop.permute.xlu1 %1029 }
 0xae5   : > { %v1040_v17 = vsel %vm364_vm2, %v3418_v7, %v1030_v15  ;;  %v1269_v15 = vld [vmem:[%s4058_s3 + $0x10] sm:$0xff] }
 0xae7   : > { %v3207_v61 = vpop.eup %3206 }
 0xae8   : > { %v951_v62 = vmul.f32 %v3207_v61, %v3205_v57  ;;  %v1034_v16 = vpop.permute.xlu1 %1033  ;;  %v1160_v57 = vld [vmem:[%s4057_s2 + $0x280] sm:$0xff] }
 0xae9   : > { %v1042_v18 = vsel %vm1041_vm4, %v1040_v17, %v1034_v16  ;;  %v3050_v58 = vpack.c.bf16 %v1160_v57, %v1158_v55  ;;  %v1267_v61 = vld [vmem:[%s4058_s3] sm:$0xff]  ;;  %v1270_v16 = vld [vmem:[%s4058_s3 + $0x18] sm:$0xff]  ;;  %v1281_v55 = vld [vmem:[%s4058_s3 + $0x70] sm:$0xff] }
 0xaea   : > { %2909 = vmatmul.mubr.msk.f32.vlgmr.msra.gmra.mrb[14].mxu1 %vm441_vm3, %v951_v62  ;;  %v3052_v62 = vpack.c.bf16 %v1284_v60, %v1283_v59  ;;  %v3054_v52 = vpack.c.bf16 %v1268_v63, %v1267_v61  ;;  %v3058_v17 = vpack.c.bf16 %v1270_v16, %v1269_v15 }
 0xaeb   : > { %1242 = vmatprep.mubr.f32.mxu1 %v3248_v20 }
 0xaec   : > { %3053 = vmatprep.subr.bf16.mxu0 %v3052_v62 }
 0xbbd   : > { %v1024_v13 = vpop.f32.mrb[14].mxu1 }
 0xbbe   : > { %1037 = vrot.lane.b32.xlu0 %v1024_v13, %s3250_s14  ;;  %v2910_v14 = vpop.f32.mrb[15].mxu1  ;;  %v1286_v13 = vld [vmem:[%s4058_s3 + $0x98] sm:$0xff] }
 0xbbf   : > { %v3056_v14 = vpack.c.bf16 %v1286_v13, %v1285_v12 }
 0xc30   : > { %v1038_v19 = vpop.permute.xlu0 %1037 }
 0xc31   : > { %v1044_v21 = vsel %vm1043_vm5, %v1042_v18, %v1038_v19  ;;  %v1287_v18 = vld [vmem:[%s4058_s3 + $0xa0] sm:$0xff]  ;;  %v1288_v19 = vld [vmem:[%s4058_s3 + $0xa8] sm:$0xff] }
 0xc32   : > { %2928 = vmatmul.mubr.msk.f32.vlgmr.msra.gmra.mrb[2].mxu0 %vm241_vm0, %v1044_v21  ;;  %v3060_v21 = vpack.c.bf16 %v1288_v19, %v1287_v18 }
 0xc33   : > { %3055 = vmatpush3.bf16.msra.mxu0 %v3054_v52 }
 0xc34   : > { %3057 = vmatprep.subr.bf16.mxu0 %v3056_v14 }
 0xc37   : > { %3059 = vmatpush3.bf16.msra.mxu0 %v3058_v17 }
 0xc38   : > { %3061 = vmatprep.subr.bf16.mxu0 %v3060_v21 }
 0xd05   : > { %v1122_v22 = vpop.f32.mrb[2].mxu0 }
 0xd06   : > { %v1126_v24 = vadd.f32 %v1122_v22, %v3302_v0  ;;  %v2929_v25 = vpop.f32.mrb[3].mxu0  ;;  %v1149_v0 = vld [vmem:[%s4057_s2 + $0x78] sm:$0xff]  ;;  %v1271_v22 = vld [vmem:[%s4058_s3 + $0x20] sm:$0xff] }
 0xd07   : > { %v3036_v33 = vpack.c.bf16 %v1149_v0, %v1147_v32  ;;  %v1289_v25 = vld [vmem:[%s4058_s3 + $0xb0] sm:$0xff]  ;;  %v1292_v32 = vld [vmem:[%s4058_s3 + $0xc8] sm:$0xff]  ;;  %v1275_v0 = vld [vmem:[%s4058_s3 + $0x40] sm:$0xff] }
 0xd08   : > { %v3498_v26 = vadd.f32 %v1127_v23, %v1126_v24  ;;  %v1272_v23 = vld [vmem:[%s4058_s3 + $0x28] sm:$0xff] }
 0xd09   : > { %3037 = vmatprep.subr.bf16.mxu1 %v3036_v33  ;;  %v3062_v24 = vpack.c.bf16 %v1272_v23, %v1271_v22  ;;  %v1276_v33 = vld [vmem:[%s4058_s3 + $0x48] sm:$0xff] }
 0xd0a   : > { %v1131_v7 = vsel %vm241_vm0, %v3498_v26, 0.0  ;;  %3039 = vmatpush1.bf16.msra.mxu1 %v3038_v36  ;;  %v1294_v36 = vld [vmem:[%s4058_s3 + $0xd8] sm:$0xff]  ;;  %v3070_v37 = vpack.c.bf16 %v1276_v33, %v1275_v0  ;;  %v1390_v33 = vld [vmem:[%s4057_s2 + $0x30] sm:$0xff] }
 0xd0b   : > { %1132 = vadd.xlane.f32.xlu1 %v1131_v7  ;;  %3041 = vmatprep.subr.bf16.mxu1 %v3040_v39  ;;  %v1290_v7 = vld [vmem:[%s4058_s3 + $0xb8] sm:$0xff]  ;;  %v3072_v38 = vpack.c.bf16 %v1294_v36, %v1293_v35  ;;  %v1277_v39 = vld [vmem:[%s4058_s3 + $0x50] sm:$0xff]  ;;  %v1389_v35 = vld [vmem:[%s4057_s2 + $0x28] sm:$0xff] }
 0xd0c   : > { %3063 = vmatpush3.bf16.msra.mxu0 %v3062_v24  ;;  %v3074_v44 = vpack.c.bf16 %v1278_v40, %v1277_v39  ;;  %v1391_v36 = vld [vmem:[%s4057_s2 + $0x80] sm:$0xff]  ;;  %v1396_v39 = vld [vmem:[%s4057_s2 + $0x138] sm:$0xff] }
 0xd0e   : > { %3043 = vmatpush1.bf16.msra.mxu1 %v3042_v42  ;;  %v1296_v42 = vld [vmem:[%s4058_s3 + $0xe8] sm:$0xff] }
 0xd0f   : > { %3045 = vmatprep.subr.bf16.mxu1 %v3044_v46  ;;  %v3076_v45 = vpack.c.bf16 %v1296_v42, %v1295_v41  ;;  %v1279_v46 = vld [vmem:[%s4058_s3 + $0x60] sm:$0xff]  ;;  %v1393_v41 = vld [vmem:[%s4057_s2 + $0xd8] sm:$0xff]  ;;  %v1395_v42 = vld [vmem:[%s4057_s2 + $0x130] sm:$0xff] }
 0xd10   : > { %v3078_v51 = vpack.c.bf16 %v1280_v47, %v1279_v46  ;;  %v1400_v46 = vld [vmem:[%s4057_s2 + $0x1e8] sm:$0xff] }
 0xd12   : > { %3047 = vmatpush1.bf16.msra.mxu1 %v3046_v50  ;;  %v1298_v50 = vld [vmem:[%s4058_s3 + $0xf8] sm:$0xff] }
 0xd13   : > { %3049 = vmatprep.subr.bf16.mxu1 %v3048_v56  ;;  %v3080_v54 = vpack.c.bf16 %v1298_v50, %v1297_v48  ;;  %v1282_v56 = vld [vmem:[%s4058_s3 + $0x78] sm:$0xff]  ;;  %v1397_v48 = vld [vmem:[%s4057_s2 + $0x188] sm:$0xff]  ;;  %v1399_v50 = vld [vmem:[%s4057_s2 + $0x1e0] sm:$0xff] }
 0xd14   : > { %v3082_v57 = vpack.c.bf16 %v1282_v56, %v1281_v55  ;;  %v1404_v55 = vld [vmem:[%s4057_s2 + $0x298] sm:$0xff] }
 0xd15   : > { %v1401_v56 = vld [vmem:[%s4057_s2 + $0x238] sm:$0xff] }
 0xd16   : > { %3051 = vmatpush1.bf16.msra.mxu1 %v3050_v58  ;;  %v2688_v58 = vld [vmem:[%s4059_s4 + $0x6] ss:$8 sm:$0x3] }
 0xd17   : > { %v1168_v59 = vrot.slane %v2688_v58, %v3369_v43  ;;  %v1172_v60 = vrot.slane %v2688_v58, %v3381_v49  ;;  %v1403_v58 = vld [vmem:[%s4057_s2 + $0x290] sm:$0xff] }
 0xd98   : > { %v1133_v27 = vpop.xlane.xlu1 %1132 }
 0xd99   : > { %v1134_v28 = vmul.f32 0.015625, %v1133_v27  ;;  %v3064_v27 = vpack.c.bf16 %v1290_v7, %v1289_v25  ;;  %v1370_v25 = vld [vmem:[%s4059_s4 + $0x7] ss:$0 sm:$0xff] }
 0xd9b   : > { %v1135_v29 = vsub.f32 %v3498_v26, %v1134_v28  ;;  %v1273_v28 = vld [vmem:[%s4058_s3 + $0x30] sm:$0xff]  ;;  %3065 = vmatprep.subr.bf16.mxu0 %v3064_v27 }
 0xd9d   : > { %v1136_v30 = vmul.f32 %v1135_v29, %v1135_v29 }
 0xd9f   : > { %v1137_v31 = vsel %vm241_vm0, %v1136_v30, 0.0  ;;  %v1291_v30 = vld [vmem:[%s4058_s3 + $0xc0] sm:$0xff] }
 0xda0   : > { %1138 = vadd.xlane.f32.xlu0 %v1137_v31  ;;  %v3068_v34 = vpack.c.bf16 %v1292_v32, %v1291_v30 }
 0xe2d   : > { %v1139_v1 = vpop.xlane.xlu0 %1138 }
 0xe2e   : > { %v1140_v3 = vmul.f32 0.015625, %v1139_v1 }
 0xe30   : > { %v1141_v4 = vadd.f32 1e-05, %v1140_v3 }
 0xe32   : > { %3208 = vrsqrt.f32 %v1141_v4 }
 0xe3c   : > { %v3209_v5 = vpop.eup %3208 }
 0xe3d   : > { %v1143_v8 = vmul.f32 %v3209_v5, %v1135_v29  ;;  %v1274_v29 = vld [vmem:[%s4058_s3 + $0x38] sm:$0xff] }
 0xe3e   : > { %v3066_v31 = vpack.c.bf16 %v1274_v29, %v1273_v28 }
 0xe3f   : > { %v1144_v10 = vmul.f32 %v1143_v8, %v1129_v6 }
 0xe40   : > { %3067 = vmatpush3.bf16.msra.mxu0 %v3066_v31 }
 0xe41   : > { %v1145_v11 = vadd.f32 %v1144_v10, %v1130_v9  ;;  %3069 = vmatprep.subr.bf16.mxu0 %v3068_v34 }
 0xe43   : > { %2689 = vmatmul.mubr.msk.f32.vlgmr.msra.gmra.mrb[16].mxu1 %vm241_vm0, %v1145_v11 }
 0xe44   : > { %1485 = vmatprep.mubr.f32.mxu1 %v3248_v20  ;;  %3071 = vmatpush3.bf16.msra.mxu0 %v3070_v37  ;;  %v3086_v37 = vpack.c.bf16 %v1391_v36, %v1389_v35 }
 0xe45   : > { %3073 = vmatprep.subr.bf16.mxu0 %v3072_v38  ;;  %v1394_v38 = vld [vmem:[%s4057_s2 + $0xe0] sm:$0xff] }
 0xe46   : > { %v3088_v40 = vpack.c.bf16 %v1396_v39, %v1394_v38 }
 0xe48   : > { %3075 = vmatpush3.bf16.msra.mxu0 %v3074_v44  ;;  %v3090_v44 = vpack.c.bf16 %v1395_v42, %v1393_v41 }
 0xe49   : > { %3077 = vmatprep.subr.bf16.mxu0 %v3076_v45  ;;  %v1398_v45 = vld [vmem:[%s4057_s2 + $0x190] sm:$0xff] }
 0xe4a   : > { %v3092_v47 = vpack.c.bf16 %v1400_v46, %v1398_v45 }
 0xe4c   : > { %3079 = vmatpush3.bf16.msra.mxu0 %v3078_v51  ;;  %v3094_v51 = vpack.c.bf16 %v1399_v50, %v1397_v48 }
 0xe4d   : > { %3081 = vmatprep.subr.bf16.mxu0 %v3080_v54  ;;  %v1402_v54 = vld [vmem:[%s4057_s2 + $0x240] sm:$0xff] }
 0xe50   : > { %3083 = vmatpush3.bf16.msra.mxu0 %v3082_v57  ;;  %v3096_v57 = vpack.c.bf16 %v1404_v55, %v1402_v54 }
 0xe51   : > { %2950 = vmatprep.subr.mxu0 %v3248_v20 }
 0xf16   : > { %v1244_v61 = vpop.f32.mrb[16].mxu1 }
 0xf17   : > { %v1245_v62 = vadd.f32 %v1244_v61, %v1168_v59  ;;  %v1246_v63 = vpop.f32.mrb[17].mxu1  ;;  %v3098_v59 = vpack.c.bf16 %v1403_v58, %v1401_v56 }
 0xf18   : > { %v1247_v52 = vadd.f32 %v1246_v63, %v1172_v60 }
 0xf19   : > { %v1251_v1 = vmul.f32 0.044715, %v1245_v62  ;;  %v1249_v18 = vmul.f32 0.5, %v1245_v62 }
 0xf1a   : > { %v1252_v3 = vmul.f32 0.044715, %v1247_v52  ;;  %v1250_v16 = vmul.f32 0.5, %v1247_v52 }
 0xf1b   : > { %v1253_v4 = vmul.f32 %v1251_v1, %v1245_v62 }
 0xf1c   : > { %v1254_v5 = vmul.f32 %v1252_v3, %v1247_v52  ;;  %v1373_v3 = vld [vmem:[%s4059_s4 + $0x11] ss:$0 sm:$0xff] }
 0xf1d   : > { %v1255_v6 = vmul.f32 %v1253_v4, %v1245_v62 }
 0xf1e   : > { %v1256_v8 = vmul.f32 %v1254_v5, %v1247_v52 }
 0xf1f   : > { %v1257_v9 = vadd.f32 %v1255_v6, %v1245_v62  ;;  %v2690_v6 = vld [vmem:[%s4059_s4 + $0x12] ss:$8 sm:$0x3] }
 0xf20   : > { %v1258_v10 = vadd.f32 %v1256_v8, %v1247_v52  ;;  %v1372_v52 = vld [vmem:[%s4059_s4 + $0x10] ss:$0 sm:$0xff]  ;;  %v1411_v8 = vrot.slane %v2690_v6, %v3369_v43 }
 0xf21   : > { %v1259_v11 = vmul.f32 0.7978846, %v1257_v9 }
 0xf22   : > { %v1260_v12 = vmul.f32 0.7978846, %v1258_v10 }
 0xf23   : > { %3210 = vtanh.f32 %v1259_v11 }
 0xf24   : > { %3212 = vtanh.f32 %v1260_v12  ;;  %v1415_v12 = vrot.slane %v2690_v6, %v3381_v49 }
 0xf2d   : > { %v3211_v13 = vpop.eup %3210 }
 0xf2e   : > { %v3213_v14 = vpop.eup %3212  ;;  %v1263_v15 = vadd.f32 1.0, %v3211_v13 }
 0xf2f   : > { %v1264_v17 = vadd.f32 1.0, %v3213_v14 }
 0xf30   : > { %v1265_v21 = vmul.f32 %v1263_v15, %v1249_v18 }
 0xf31   : > { %v1266_v19 = vmul.f32 %v1264_v17, %v1250_v16 }
 0xf33   : > { %1363 = vmatprep.mubr.f32.mxu0 %v1266_v19 }
 0xf34   : > { %1364 = vmatmul.mubr.f32.vlgmr.msra.gmra.mrb[4].mxu0 %v1265_v21 }
 0xf35   : > { %2952 = vmatprep.mubr.msk.f32.mxu0 %vm3249_vm1, %v3248_v20 }
0x1007   : > { %v2799_v22 = vpop.f32.mrb[4].mxu0 }
0x1008   : > { %v2800_v23 = vpop.f32.mrb[5].mxu0 }
0x1009   : > { %v2801_v24 = vadd.f32 %v2800_v23, %v2799_v22 }
0x100b   : > { %v1369_v7 = vadd.f32 %v2801_v24, %v3498_v26  ;;  %v1392_v26 = vld [vmem:[%s4057_s2 + $0x88] sm:$0xff] }
0x100c   : > { %v3084_v34 = vpack.c.bf16 %v1392_v26, %v1390_v33 }
0x100d   : > { %v3668_v27 = vadd.f32 %v1370_v25, %v1369_v7 }
0x100e   : > { %3085 = vmatprep.subr.bf16.mxu1 %v3084_v34 }
0x100f   : > { %v1374_v28 = vsel %vm241_vm0, %v3668_v27, 0.0  ;;  %3087 = vmatpush1.bf16.msra.mxu1 %v3086_v37 }
0x1010   : > { %1375 = vadd.xlane.f32.xlu1 %v1374_v28  ;;  %3089 = vmatprep.subr.bf16.mxu1 %v3088_v40 }
0x1013   : > { %3091 = vmatpush1.bf16.msra.mxu1 %v3090_v44 }
0x1014   : > { %3093 = vmatprep.subr.bf16.mxu1 %v3092_v47 }
0x1017   : > { %3095 = vmatpush1.bf16.msra.mxu1 %v3094_v51 }
0x1018   : > { %3097 = vmatprep.subr.bf16.mxu1 %v3096_v57 }
0x101b   : > { %3099 = vmatpush1.bf16.msra.mxu1 %v3098_v59 }
0x101c   : > { %2930 = vmatprep.subr.mxu1 %v3248_v20 }
0x109d   : > { %v1376_v29 = vpop.xlane.xlu1 %1375 }
0x109e   : > { %v1377_v30 = vmul.f32 0.015625, %v1376_v29 }
0x10a0   : > { %v1378_v31 = vsub.f32 %v3668_v27, %v1377_v30 }
0x10a2   : > { %v1379_v32 = vmul.f32 %v1378_v31, %v1378_v31 }
0x10a4   : > { %v1380_v0 = vsel %vm241_vm0, %v1379_v32, 0.0 }
0x10a5   : > { %1381 = vadd.xlane.f32.xlu1 %v1380_v0 }
0x1132   : > { %v1382_v60 = vpop.xlane.xlu1 %1381 }
0x1133   : > { %v1383_v61 = vmul.f32 0.015625, %v1382_v60 }
0x1135   : > { %v1384_v62 = vadd.f32 1e-05, %v1383_v61 }
0x1137   : > { %3214 = vrsqrt.f32 %v1384_v62 }
0x1141   : > { %v3215_v63 = vpop.eup %3214 }
0x1142   : > { %v1386_v1 = vmul.f32 %v3215_v63, %v1378_v31 }
0x1144   : > { %v1387_v4 = vmul.f32 %v1386_v1, %v1372_v52 }
0x1146   : > { %v1388_v5 = vadd.f32 %v1387_v4, %v1373_v3 }
0x1148   : > { %2691 = vmatmul.mubr.msk.f32.vlgmr.msra.gmra.mrb[18].mxu1 %vm241_vm0, %v1388_v5 }
0x1149   : > { %2932 = vmatprep.mubr.msk.f32.mxu1 %vm3249_vm1, %v3248_v20 }
0x121b   : > { %v1487_v9 = vpop.f32.mrb[18].mxu1 }
0x121c   : > { %v1488_v10 = vadd.f32 %v1487_v9, %v1411_v8  ;;  %v1489_v11 = vpop.f32.mrb[19].mxu1 }
0x121d   : > { %v3745_v14 = vadd.f32 %v1489_v11, %v1415_v12 }
0x121e   : > { %1493 = vrot.lane.b32.xlu1 %v1488_v10, %s3251_s15 }
0x1222   : > { %1655 = vrot.lane.b32.xlu1 %v1488_v10, %s3252_s21 }
0x1226   : > { %1825 = vrot.lane.b32.xlu1 %v1488_v10, %s3253_s22 }
0x122a   : > { %1823 = vrot.lane.b32.xlu1 %v1488_v10, %s3254_s23 }
0x122e   : > { %1992 = vrot.lane.b32.xlu1 %v1488_v10, %s3255_s24 }
0x1232   : > { %1990 = vrot.lane.b32.xlu1 %v1488_v10, %s3256_s25 }
0x1290   : > { %v1494_v13 = vpop.permute.xlu1 %1493 }
0x1291   : > { %2931 = vmatpush3.xpose.msk.msra.mxu1 %vm364_vm2, %v1494_v13 }
0x1292   : > { %2935 = vmatprep.subr.mxu1 %v3248_v20 }
0x1294   : > { %2933 = vmatmul.mubr.msk.f32.vlgmr.msra.gmra.mrb[20].mxu1 %vm364_vm2, %v1488_v10  ;;  %v1656_v15 = vpop.permute.xlu1 %1655 }
0x1295   : > { %2936 = vmatpush3.msra.mxu1 %v3745_v14  ;;  %2937 = vmatprep.mubr.msk.f32.mxu1 %vm3249_vm1, %v3248_v20 }
0x1296   : > { %2940 = vmatprep.subr.mxu1 %v3248_v20 }
0x1298   : > { %v1826_v16 = vpop.permute.xlu1 %1825 }
0x1299   : > { %2951 = vmatpush3.xpose.msk.msra.mxu0 %vm364_vm2, %v1826_v16 }
0x129a   : > { %2960 = vmatprep.subr.mxu0 %v3248_v20 }
0x129c   : > { %v1824_v17 = vpop.permute.xlu1 %1823 }
0x129d   : > { %2953 = vmatmul.mubr.msk.f32.vlgmr.msra.gmra.mrb[6].mxu0 %vm364_vm2, %v1824_v17 }
0x129e   : > { %2962 = vmatprep.mubr.msk.f32.mxu0 %vm3249_vm1, %v3248_v20 }
0x12a0   : > { %v1993_v18 = vpop.permute.xlu1 %1992 }
0x12a1   : > { %2961 = vmatpush3.xpose.msk.msra.mxu0 %vm364_vm2, %v1993_v18 }
0x12a2   : > { %3100 = vmatprep.subr.bf16.mxu0 %v3257_v2 }
0x12a4   : > { %v1991_v19 = vpop.permute.xlu1 %1990 }
0x12a5   : > { %2963 = vmatmul.mubr.msk.f32.vlgmr.msra.gmra.mrb[8].mxu0 %vm364_vm2, %v1991_v19  ;;  %v2172_v19 = vld [vmem:[%s4057_s2 + $0x38] sm:$0xff] }
0x12a6   : > { %2986 = vmatprep.mubr.msk.f32.mxu0 %vm3249_vm1, %v3248_v20 }
0x1367   : > { %v1565_v21 = vpop.f32.mrb[20].mxu1 }
0x1368   : > { %v1569_v22 = vmul.f32 0.25, %v1565_v21  ;;  %v2934_v23 = vpop.f32.mrb[21].mxu1  ;;  %v2173_v21 = vld [vmem:[%s4057_s2 + $0x90] sm:$0xff] }
0x1369   : > { %v3101_v23 = vpack.c.bf16 %v2173_v21, %v2172_v19  ;;  %v2724_v19 = vld [vmem:[%s4058_s3 + $0x188] sm:$0xff]  ;;  %v2707_v21 = vld [vmem:[%s4058_s3 + $0x100] sm:$0xff] }
0x136a   : > { %v1570_v24 = vadd.f32 %v1569_v22, %v3398_v53  ;;  %v2174_v22 = vld [vmem:[%s4057_s2 + $0xe8] sm:$0xff] }
0x136b   : > { %3102 = vmatpush3.bf16.msra.mxu0 %v3101_v23  ;;  %v2708_v23 = vld [vmem:[%s4058_s3 + $0x108] sm:$0xff] }
0x136c   : > { %v1571_v25 = vsel %vm441_vm3, %v1570_v24, -inf  ;;  %3103 = vmatprep.subr.bf16.mxu0 %v3257_v2 }
0x136d   : > { %1572 = vmax.xlane.f32.xlu0 %v1571_v25 }
0x1370   : > { %v1897_v7 = vpop.f32.mrb[6].mxu0 }
0x1371   : > { %v2954_v28 = vpop.f32.mrb[7].mxu0  ;;  %v1901_v34 = vmul.f32 0.25, %v1897_v7  ;;  %v2176_v7 = vld [vmem:[%s4057_s2 + $0x198] sm:$0xff] }
0x1372   : > { %v2177_v28 = vld [vmem:[%s4057_s2 + $0x1f0] sm:$0xff] }
0x1373   : > { %v1902_v36 = vadd.f32 %v1901_v34, %v3398_v53 }
0x1375   : > { %v1903_v37 = vsel %vm441_vm3, %v1902_v36, -inf }
0x1378   : > { %v2064_v29 = vpop.f32.mrb[8].mxu0 }
0x1379   : > { %v2964_v30 = vpop.f32.mrb[9].mxu0  ;;  %v2068_v35 = vmul.f32 0.25, %v2064_v29  ;;  %v3107_v29 = vpack.c.bf16 %v2177_v28, %v2176_v7 }
0x137a   : > { %v2178_v30 = vld [vmem:[%s4057_s2 + $0x248] sm:$0xff] }
0x137b   : > { %v2069_v38 = vadd.f32 %v2068_v35, %v3398_v53 }
0x137d   : > { %v2070_v39 = vsel %vm441_vm3, %v2069_v38, -inf }
0x13fa   : > { %v1573_v31 = vpop.xlane.xlu0 %1572 }
0x13fb   : > { %v1574_v32 = vsub.f32 %v1570_v24, %v1573_v31  ;;  %v2175_v24 = vld [vmem:[%s4057_s2 + $0x140] sm:$0xff] }
0x13fc   : > { %v3104_v25 = vpack.c.bf16 %v2175_v24, %v2174_v22  ;;  %v2179_v31 = vld [vmem:[%s4057_s2 + $0x2a0] sm:$0xff]  ;;  %v3130_v24 = vpack.c.bf16 %v2708_v23, %v2707_v21 }
0x13fd   : > { %v1575_v0 = vmul.f32 1.442695, %v1574_v32  ;;  %v3110_v32 = vpack.c.bf16 %v2179_v31, %v2178_v30  ;;  %v2256_v30 = vld [vmem:[%s4059_s4 + $0x14] ss:$0 sm:$0xff] }
0x13fe   : > { %3105 = vmatpush3.bf16.msra.mxu0 %v3104_v25 }
0x13ff   : > { %3216 = vpow2.f32 %v1575_v0  ;;  %3106 = vmatprep.subr.bf16.mxu0 %v3257_v2 }
0x1402   : > { %3108 = vmatpush3.bf16.msra.mxu0 %v3107_v29 }
0x1403   : > { %3109 = vmatprep.subr.bf16.mxu0 %v3257_v2 }
0x1406   : > { %3111 = vmatpush3.bf16.msra.mxu0 %v3110_v32  ;;  %v2257_v32 = vld [vmem:[%s4059_s4 + $0x15] ss:$0 sm:$0xff] }
0x1409   : > { %v3217_v33 = vpop.eup %3216 }
0x140a   : > { %v1577_v26 = vsel %vm441_vm3, %v3217_v33, 0.0 }
0x140b   : > { %1578 = vadd.xlane.f32.xlu0 %v1577_v26 }
0x1421   : > { %1657 = vrot.lane.b32.xlu0 %v1488_v10, %s3250_s14 }
0x1440   : > { %1904 = vmax.xlane.f32.xlu0 %v1903_v37 }
0x1444   : > { %2071 = vmax.xlane.f32.xlu0 %v2070_v39 }
0x1498   : > { %v1579_v40 = vpop.xlane.xlu0 %1578 }
0x1499   : > { %3218 = vrcp.f32 %v1579_v40 }
0x149c   : > { %v1658_v44 = vpop.permute.xlu0 %1657 }
0x14a3   : > { %v3219_v41 = vpop.eup %3218 }
0x14a4   : > { %v1581_v42 = vmul.f32 %v3219_v41, %v3217_v33 }
0x14a6   : > { %2938 = vmatmul.mubr.msk.f32.vlgmr.msra.gmra.mrb[22].mxu1 %vm441_vm3, %v1581_v42 }
0x14a7   : > { %2941 = vmatpush3.xpose.msk.msra.mxu1 %vm364_vm2, %v1658_v44  ;;  %2942 = vmatprep.mubr.msk.f32.mxu1 %vm3249_vm1, %v3248_v20 }
0x14a8   : > { %2945 = vmatprep.subr.mxu1 %v3248_v20 }
0x14aa   : > { %2943 = vmatmul.mubr.msk.f32.vlgmr.msra.gmra.mrb[24].mxu1 %vm364_vm2, %v1656_v15 }
0x14ab   : > { %2947 = vmatprep.mubr.msk.f32.mxu1 %vm3249_vm1, %v3248_v20 }
0x14cd   : > { %v1905_v45 = vpop.xlane.xlu0 %1904 }
0x14ce   : > { %v1906_v46 = vsub.f32 %v1902_v36, %v1905_v45  ;;  %v2254_v45 = vld [vmem:[%s4059_s4 + $0x13] ss:$0 sm:$0xff] }
0x14d0   : > { %v1907_v47 = vmul.f32 1.442695, %v1906_v46 }
0x14d1   : > { %v2072_v51 = vpop.xlane.xlu0 %2071 }
0x14d2   : > { %3220 = vpow2.f32 %v1907_v47  ;;  %v2073_v56 = vsub.f32 %v2069_v38, %v2072_v51 }
0x14d4   : > { %v2074_v57 = vmul.f32 1.442695, %v2073_v56 }
0x14d6   : > { %3222 = vpow2.f32 %v2074_v57 }
0x14dc   : > { %v3221_v48 = vpop.eup %3220 }
0x14dd   : > { %v1909_v50 = vsel %vm441_vm3, %v3221_v48, 0.0 }
0x14de   : > { %1910 = vadd.xlane.f32.xlu0 %v1909_v50 }
0x14e0   : > { %v3223_v1 = vpop.eup %3222 }
0x14e1   : > { %v2076_v3 = vsel %vm441_vm3, %v3223_v1, 0.0 }
0x14f4   : > { %1747 = vrot.lane.b32.xlu0 %v3745_v14, %s3252_s21 }
0x156b   : > { %v1911_v54 = vpop.xlane.xlu0 %1910 }
0x156f   : > { %v1748_v55 = vpop.permute.xlu0 %1747 }
0x1570   : > { %2946 = vmatpush3.msra.mxu1 %v1748_v55 }
0x1571   : > { %2955 = vmatprep.subr.mxu1 %v3248_v20 }
0x1579   : > { %v3782_v58 = vpop.f32.mrb[22].mxu1 }
0x157a   : > { %v2939_v59 = vpop.f32.mrb[23].mxu1 }
0x157d   : > { %v1729_v60 = vpop.f32.mrb[24].mxu1 }
0x157e   : > { %v1733_v61 = vmul.f32 0.25, %v1729_v60  ;;  %v2944_v62 = vpop.f32.mrb[25].mxu1  ;;  %v2273_v60 = vld [vmem:[%s4057_s2 + $0x40] sm:$0xff] }
0x1580   : > { %v1734_v63 = vadd.f32 %v1733_v61, %v3398_v53  ;;  %v2275_v61 = vld [vmem:[%s4057_s2 + $0x98] sm:$0xff] }
0x1581   : > { %v3114_v62 = vpack.c.bf16 %v2275_v61, %v2273_v60  ;;  %v2734_v60 = vld [vmem:[%s4058_s3 + $0x1d8] sm:$0xff] }
0x1582   : > { %v1735_v52 = vsel %vm441_vm3, %v1734_v63, -inf }
0x1583   : > { %1736 = vmax.xlane.f32.xlu1 %v1735_v52  ;;  %v2280_v52 = vld [vmem:[%s4057_s2 + $0x150] sm:$0xff] }
0x1587   : > { %2077 = vadd.xlane.f32.xlu1 %v2076_v3  ;;  %v2277_v3 = vld [vmem:[%s4057_s2 + $0xf0] sm:$0xff] }
0x1598   : > { %1914 = vrot.lane.b32.xlu1 %v3745_v14, %s3254_s23 }
0x1610   : > { %v1737_v4 = vpop.xlane.xlu1 %1736 }
0x1611   : > { %v1738_v5 = vsub.f32 %v1734_v63, %v1737_v4  ;;  %v2278_v63 = vld [vmem:[%s4057_s2 + $0xf8] sm:$0xff]  ;;  %v2279_v4 = vld [vmem:[%s4057_s2 + $0x148] sm:$0xff] }
0x1613   : > { %v1739_v6 = vmul.f32 1.442695, %v1738_v5  ;;  %v3118_v5 = vpack.c.bf16 %v2279_v4, %v2277_v3  ;;  %v2736_v3 = vld [vmem:[%s4058_s3 + $0x1e8] sm:$0xff] }
0x1614   : > { %v2078_v53 = vpop.xlane.xlu1 %2077 }
0x1615   : > { %3224 = vpow2.f32 %v1739_v6  ;;  %v2282_v6 = vld [vmem:[%s4057_s2 + $0x1a8] sm:$0xff] }
0x1618   : > { %v1915_v10 = vpop.permute.xlu1 %1914 }
0x161f   : > { %v3225_v8 = vpop.eup %3224 }
0x1620   : > { %v1741_v9 = vsel %vm441_vm3, %v3225_v8, 0.0 }
0x1621   : > { %1742 = vadd.xlane.f32.xlu1 %v1741_v9 }
0x1632   : > { %2081 = vrot.lane.b32.xlu1 %v3745_v14, %s3256_s25 }
0x16ae   : > { %v1743_v11 = vpop.xlane.xlu1 %1742 }
0x16af   : > { %3226 = vrcp.f32 %v1743_v11 }
0x16b0   : > { %3228 = vrcp.f32 %v1911_v54 }
0x16b1   : > { %3230 = vrcp.f32 %v2078_v53  ;;  %v2281_v53 = vld [vmem:[%s4057_s2 + $0x1a0] sm:$0xff] }
0x16b2   : > { %v2082_v14 = vpop.permute.xlu1 %2081 }
0x16b9   : > { %v3227_v12 = vpop.eup %3226 }
0x16ba   : > { %v1745_v13 = vmul.f32 %v3227_v12, %v3225_v8  ;;  %v3229_v15 = vpop.eup %3228  ;;  %v2284_v8 = vld [vmem:[%s4057_s2 + $0x200] sm:$0xff]  ;;  %v2286_v12 = vld [vmem:[%s4057_s2 + $0x258] sm:$0xff] }
0x16bb   : > { %v1913_v16 = vmul.f32 %v3229_v15, %v3221_v48  ;;  %v3231_v17 = vpop.eup %3230  ;;  %v3120_v9 = vpack.c.bf16 %v2284_v8, %v2282_v6  ;;  %v2285_v15 = vld [vmem:[%s4057_s2 + $0x250] sm:$0xff]  ;;  %v2719_v6 = vld [vmem:[%s4058_s3 + $0x160] sm:$0xff]  ;;  %v2720_v8 = vld [vmem:[%s4058_s3 + $0x168] sm:$0xff] }
0x16bc   : > { %2948 = vmatmul.mubr.msk.f32.vlgmr.msra.gmra.mrb[26].mxu1 %vm441_vm3, %v1745_v13  ;;  %v2080_v18 = vmul.f32 %v3231_v17, %v3223_v1  ;;  %v3116_v1 = vpack.c.bf16 %v2280_v52, %v2278_v63  ;;  %v2288_v13 = vld [vmem:[%s4057_s2 + $0x2b0] sm:$0xff]  ;;  %v2287_v17 = vld [vmem:[%s4057_s2 + $0x2a8] sm:$0xff]  ;;  %v2718_v52 = vld [vmem:[%s4058_s3 + $0x158] sm:$0xff] }
0x16bd   : > { %2956 = vmatpush3.msra.mxu1 %v1915_v10  ;;  %2957 = vmatprep.mubr.msk.f32.mxu1 %vm3249_vm1, %v3248_v20  ;;  %v2283_v10 = vld [vmem:[%s4057_s2 + $0x1f8] sm:$0xff]  ;;  %v2717_v63 = vld [vmem:[%s4058_s3 + $0x150] sm:$0xff] }
0x16be   : > { %2965 = vmatprep.subr.mxu1 %v3248_v20  ;;  %v3122_v11 = vpack.c.bf16 %v2283_v10, %v2281_v53  ;;  %v3150_v4 = vpack.c.bf16 %v2718_v52, %v2717_v63  ;;  %v2738_v53 = vld [vmem:[%s4058_s3 + $0x1f8] sm:$0xff]  ;;  %v3154_v10 = vpack.c.bf16 %v2720_v8, %v2719_v6  ;;  %v2501_v6 = vld [vmem:[%s4059_s4 + $0x21] ss:$0 sm:$0xff] }
0x16c0   : > { %2958 = vmatmul.mubr.msk.f32.vlgmr.msra.gmra.mrb[28].mxu1 %vm441_vm3, %v1913_v16  ;;  %v3124_v16 = vpack.c.bf16 %v2288_v13, %v2286_v12  ;;  %v2721_v12 = vld [vmem:[%s4058_s3 + $0x170] sm:$0xff]  ;;  %v2722_v13 = vld [vmem:[%s4058_s3 + $0x178] sm:$0xff] }
0x16c1   : > { %2966 = vmatpush3.msra.mxu1 %v2082_v14  ;;  %2967 = vmatprep.mubr.msk.f32.mxu1 %vm3249_vm1, %v3248_v20  ;;  %v3126_v14 = vpack.c.bf16 %v2287_v17, %v2285_v15  ;;  %v3158_v15 = vpack.c.bf16 %v2722_v13, %v2721_v12 }
0x16c4   : > { %2968 = vmatmul.mubr.msk.f32.vlgmr.msra.gmra.mrb[30].mxu1 %vm441_vm3, %v2080_v18  ;;  %v2723_v18 = vld [vmem:[%s4058_s3 + $0x180] sm:$0xff] }
0x16c5   : > { %2369 = vmatprep.mubr.f32.mxu1 %v3248_v20  ;;  %v3128_v22 = vpack.c.bf16 %v2724_v19, %v2723_v18 }
0x16c7   : > { %3129 = vmatprep.subr.bf16.mxu0 %v3128_v22 }
0x178f   : > { %v1819_v0 = vpop.f32.mrb[26].mxu1 }
0x1790   : > { %2158 = vrot.lane.b32.xlu0 %v1819_v0, %s3255_s24  ;;  %v2949_v33 = vpop.f32.mrb[27].mxu1 }
0x1793   : > { %v1986_v26 = vpop.f32.mrb[28].mxu1 }
0x1794   : > { %2162 = vrot.lane.b32.xlu1 %v1986_v26, %s3253_s22  ;;  %v2959_v34 = vpop.f32.mrb[29].mxu1  ;;  %v2725_v26 = vld [vmem:[%s4058_s3 + $0x190] sm:$0xff] }
0x1795   : > { %v2726_v34 = vld [vmem:[%s4058_s3 + $0x198] sm:$0xff] }
0x1797   : > { %v2153_v35 = vpop.f32.mrb[30].mxu1 }
0x1798   : > { %2166 = vrot.lane.b32.xlu0 %v2153_v35, %s3250_s14  ;;  %v2969_v36 = vpop.f32.mrb[31].mxu1  ;;  %v3132_v35 = vpack.c.bf16 %v2726_v34, %v2725_v26 }
0x1799   : > { %v2709_v36 = vld [vmem:[%s4058_s3 + $0x110] sm:$0xff] }
0x1802   : > { %v2159_v37 = vpop.permute.xlu0 %2158 }
0x1803   : > { %v2169_v39 = vsel %vm364_vm2, %v3782_v58, %v2159_v37  ;;  %v2274_v58 = vld [vmem:[%s4057_s2 + $0x48] sm:$0xff]  ;;  %v2710_v37 = vld [vmem:[%s4058_s3 + $0x118] sm:$0xff] }
0x1806   : > { %v2163_v38 = vpop.permute.xlu1 %2162 }
0x1807   : > { %v2170_v40 = vsel %vm1041_vm4, %v2169_v39, %v2163_v38  ;;  %v3134_v38 = vpack.c.bf16 %v2710_v37, %v2709_v36  ;;  %v2728_v39 = vld [vmem:[%s4058_s3 + $0x1a8] sm:$0xff] }
0x180a   : > { %v2167_v41 = vpop.permute.xlu0 %2166 }
0x180b   : > { %v2171_v42 = vsel %vm1043_vm5, %v2170_v40, %v2167_v41  ;;  %v2711_v41 = vld [vmem:[%s4058_s3 + $0x120] sm:$0xff] }
0x180c   : > { %2987 = vmatmul.mubr.msk.f32.vlgmr.msra.gmra.mrb[10].mxu0 %vm241_vm0, %v2171_v42  ;;  %v2712_v42 = vld [vmem:[%s4058_s3 + $0x128] sm:$0xff] }
0x180d   : > { %3131 = vmatpush3.bf16.msra.mxu0 %v3130_v24 }
0x180e   : > { %3133 = vmatprep.subr.bf16.mxu0 %v3132_v35 }
0x1811   : > { %3135 = vmatpush3.bf16.msra.mxu0 %v3134_v38 }
0x18df   : > { %v2249_v44 = vpop.f32.mrb[10].mxu0 }
0x18e0   : > { %v2253_v46 = vadd.f32 %v2249_v44, %v3668_v27  ;;  %v2988_v47 = vpop.f32.mrb[11].mxu0  ;;  %v2276_v27 = vld [vmem:[%s4057_s2 + $0xa0] sm:$0xff]  ;;  %v3138_v44 = vpack.c.bf16 %v2712_v42, %v2711_v41 }
0x18e1   : > { %v3112_v59 = vpack.c.bf16 %v2276_v27, %v2274_v58  ;;  %v2716_v58 = vld [vmem:[%s4058_s3 + $0x148] sm:$0xff] }
0x18e2   : > { %v3840_v48 = vadd.f32 %v2254_v45, %v2253_v46  ;;  %v2729_v45 = vld [vmem:[%s4058_s3 + $0x1b0] sm:$0xff]  ;;  %v2730_v46 = vld [vmem:[%s4058_s3 + $0x1b8] sm:$0xff] }
0x18e3   : > { %3113 = vmatprep.subr.bf16.mxu1 %v3112_v59  ;;  %v3140_v47 = vpack.c.bf16 %v2730_v46, %v2729_v45  ;;  %v2733_v59 = vld [vmem:[%s4058_s3 + $0x1d0] sm:$0xff] }
0x18e4   : > { %v2258_v50 = vsel %vm241_vm0, %v3840_v48, 0.0  ;;  %3115 = vmatpush1.bf16.msra.mxu1 %v3114_v62  ;;  %v3148_v62 = vpack.c.bf16 %v2734_v60, %v2733_v59  ;;  %v2522_v59 = vld [vmem:[%s4057_s2 + $0x208] sm:$0xff] }
0x18e5   : > { %2259 = vadd.xlane.f32.xlu1 %v2258_v50  ;;  %3117 = vmatprep.subr.bf16.mxu1 %v3116_v1  ;;  %v2713_v50 = vld [vmem:[%s4058_s3 + $0x130] sm:$0xff]  ;;  %v2735_v1 = vld [vmem:[%s4058_s3 + $0x1e0] sm:$0xff] }
0x18e8   : > { %3119 = vmatpush1.bf16.msra.mxu1 %v3118_v5  ;;  %v3152_v5 = vpack.c.bf16 %v2736_v3, %v2735_v1 }
0x18e9   : > { %3121 = vmatprep.subr.bf16.mxu1 %v3120_v9  ;;  %v2737_v9 = vld [vmem:[%s4058_s3 + $0x1f0] sm:$0xff] }
0x18ec   : > { %3123 = vmatpush1.bf16.msra.mxu1 %v3122_v11  ;;  %v3156_v11 = vpack.c.bf16 %v2738_v53, %v2737_v9  ;;  %v2525_v53 = vld [vmem:[%s4059_s4 + $0x22] ss:$0 sm:$0xff] }
0x18ed   : > { %3125 = vmatprep.subr.bf16.mxu1 %v3124_v16  ;;  %v2705_v16 = vld [vmem:[%s4059_s4 + $0x16] ss:$8 sm:$0x3] }
0x18ee   : > { %v2295_v17 = vrot.slane %v2705_v16, %v3369_v43 }
0x18f0   : > { %3127 = vmatpush1.bf16.msra.mxu1 %v3126_v14  ;;  %v2299_v14 = vrot.slane %v2705_v16, %v3381_v49 }
0x18f1   : > { %3160 = vmatprep.subr.bf16.mxu1 %v3257_v2 }
0x1972   : > { %v2260_v51 = vpop.xlane.xlu1 %2259 }
0x1973   : > { %v2261_v54 = vmul.f32 0.015625, %v2260_v51  ;;  %v2714_v51 = vld [vmem:[%s4058_s3 + $0x138] sm:$0xff] }
0x1975   : > { %v2262_v55 = vsub.f32 %v3840_v48, %v2261_v54  ;;  %v2731_v54 = vld [vmem:[%s4058_s3 + $0x1c0] sm:$0xff] }
0x1977   : > { %v2263_v56 = vmul.f32 %v2262_v55, %v2262_v55 }
0x1979   : > { %v2264_v57 = vsel %vm241_vm0, %v2263_v56, 0.0  ;;  %v2732_v56 = vld [vmem:[%s4058_s3 + $0x1c8] sm:$0xff] }
0x197a   : > { %2265 = vadd.xlane.f32.xlu0 %v2264_v57  ;;  %v2715_v57 = vld [vmem:[%s4058_s3 + $0x140] sm:$0xff]  ;;  %v3144_v27 = vpack.c.bf16 %v2732_v56, %v2731_v54  ;;  %v2517_v54 = vld [vmem:[%s4057_s2 + $0x50] sm:$0xff] }
0x197b   : > { %v3146_v61 = vpack.c.bf16 %v2716_v58, %v2715_v57  ;;  %v2519_v56 = vld [vmem:[%s4057_s2 + $0x100] sm:$0xff]  ;;  %v2520_v57 = vld [vmem:[%s4057_s2 + $0x158] sm:$0xff] }
0x197c   : > { %v3164_v58 = vpack.c.bf16 %v2520_v57, %v2519_v56 }
0x1a07   : > { %v2266_v25 = vpop.xlane.xlu0 %2265 }
0x1a08   : > { %v2267_v7 = vmul.f32 0.015625, %v2266_v25 }
0x1a0a   : > { %v2268_v28 = vadd.f32 1e-05, %v2267_v7 }
0x1a0c   : > { %3232 = vrsqrt.f32 %v2268_v28 }
0x1a16   : > { %v3233_v29 = vpop.eup %3232 }
0x1a17   : > { %v2270_v31 = vmul.f32 %v3233_v29, %v2262_v55  ;;  %v3142_v55 = vpack.c.bf16 %v2714_v51, %v2713_v50 }
0x1a19   : > { %v2271_v0 = vmul.f32 %v2270_v31, %v2256_v30 }
0x1a1b   : > { %v2272_v33 = vadd.f32 %v2271_v0, %v2257_v32 }
0x1a1d   : > { %2706 = vmatmul.mubr.msk.f32.vlgmr.msra.gmra.mrb[32].mxu1 %vm241_vm0, %v2272_v33 }
0x1a1e   : > { %3005 = vmatprep.mubr.msk.f32.mxu1 %vm3249_vm1, %v3248_v20  ;;  %v2727_v20 = vld [vmem:[%s4058_s3 + $0x1a0] sm:$0xff] }
0x1a1f   : > { %v3136_v40 = vpack.c.bf16 %v2728_v39, %v2727_v20 }
0x1a21   : > { %3137 = vmatprep.subr.bf16.mxu0 %v3136_v40  ;;  %v2498_v40 = vld [vmem:[%s4059_s4 + $0x17] ss:$0 sm:$0xff] }
0x1a22   : > { %3139 = vmatpush3.bf16.msra.mxu0 %v3138_v44 }
0x1a23   : > { %3141 = vmatprep.subr.bf16.mxu0 %v3140_v47 }
0x1a26   : > { %3143 = vmatpush3.bf16.msra.mxu0 %v3142_v55  ;;  %v2518_v55 = vld [vmem:[%s4057_s2 + $0xa8] sm:$0xff] }
0x1a27   : > { %3145 = vmatprep.subr.bf16.mxu0 %v3144_v27  ;;  %v2521_v27 = vld [vmem:[%s4057_s2 + $0x1b0] sm:$0xff] }
0x1a28   : > { %v3167_v60 = vpack.c.bf16 %v2522_v59, %v2521_v27 }
0x1a2a   : > { %3147 = vmatpush3.bf16.msra.mxu0 %v3146_v61  ;;  %v2523_v61 = vld [vmem:[%s4057_s2 + $0x260] sm:$0xff] }
0x1a2b   : > { %3149 = vmatprep.subr.bf16.mxu0 %v3148_v62  ;;  %v2524_v62 = vld [vmem:[%s4057_s2 + $0x2b8] sm:$0xff] }
0x1a2c   : > { %v3170_v63 = vpack.c.bf16 %v2524_v62, %v2523_v61 }
0x1a2e   : > { %3151 = vmatpush3.bf16.msra.mxu0 %v3150_v4 }
0x1a2f   : > { %3153 = vmatprep.subr.bf16.mxu0 %v3152_v5 }
0x1a32   : > { %3155 = vmatpush3.bf16.msra.mxu0 %v3154_v10 }
0x1a33   : > { %3157 = vmatprep.subr.bf16.mxu0 %v3156_v11 }
0x1a36   : > { %3159 = vmatpush3.bf16.msra.mxu0 %v3158_v15 }
0x1af0   : > { %v2371_v18 = vpop.f32.mrb[32].mxu1 }
0x1af1   : > { %v2372_v19 = vadd.f32 %v2371_v18, %v2295_v17  ;;  %v2373_v21 = vpop.f32.mrb[33].mxu1 }
0x1af2   : > { %v2374_v22 = vadd.f32 %v2373_v21, %v2299_v14 }
0x1af3   : > { %v2378_v23 = vmul.f32 0.044715, %v2372_v19  ;;  %v2376_v35 = vmul.f32 0.5, %v2372_v19 }
0x1af4   : > { %v2379_v24 = vmul.f32 0.044715, %v2374_v22  ;;  %v2377_v49 = vmul.f32 0.5, %v2374_v22 }
0x1af5   : > { %v2380_v25 = vmul.f32 %v2378_v23, %v2372_v19 }
0x1af6   : > { %v2381_v7 = vmul.f32 %v2379_v24, %v2374_v22 }
0x1af7   : > { %v2382_v28 = vmul.f32 %v2380_v25, %v2372_v19 }
0x1af8   : > { %v2383_v29 = vmul.f32 %v2381_v7, %v2374_v22 }
0x1af9   : > { %v2384_v30 = vadd.f32 %v2382_v28, %v2372_v19 }
0x1afa   : > { %v2385_v31 = vadd.f32 %v2383_v29, %v2374_v22 }
0x1afb   : > { %v2386_v32 = vmul.f32 0.7978846, %v2384_v30 }
0x1afc   : > { %v2387_v0 = vmul.f32 0.7978846, %v2385_v31 }
0x1afd   : > { %3234 = vtanh.f32 %v2386_v32 }
0x1afe   : > { %3236 = vtanh.f32 %v2387_v0 }
0x1b07   : > { %v3235_v33 = vpop.eup %3234 }
0x1b08   : > { %v3237_v43 = vpop.eup %3236  ;;  %v2390_v26 = vadd.f32 1.0, %v3235_v33 }
0x1b09   : > { %v2391_v34 = vadd.f32 1.0, %v3237_v43 }
0x1b0a   : > { %v2392_v37 = vmul.f32 %v2390_v26, %v2376_v35 }
0x1b0b   : > { %v2393_v36 = vmul.f32 %v2391_v34, %v2377_v49 }
0x1b0d   : > { %2491 = vmatprep.mubr.f32.mxu0 %v2393_v36 }
0x1b0e   : > { %2492 = vmatmul.mubr.f32.vlgmr.msra.gmra.mrb[12].mxu0 %v2392_v37 }
0x1be1   : > { %v2859_v38 = vpop.f32.mrb[12].mxu0 }
0x1be2   : > { %v2860_v20 = vpop.f32.mrb[13].mxu0 }
0x1be3   : > { %v2861_v39 = vadd.f32 %v2860_v20, %v2859_v38 }
0x1be5   : > { %v2497_v41 = vadd.f32 %v2861_v39, %v3840_v48  ;;  %v3161_v48 = vpack.c.bf16 %v2518_v55, %v2517_v54 }
0x1be7   : > { %v2499_v42 = vadd.f32 %v2498_v40, %v2497_v41  ;;  %3162 = vmatpush3.bf16.msra.mxu1 %v3161_v48 }
0x1be8   : > { %3163 = vmatprep.subr.bf16.mxu1 %v3257_v2 }
0x1be9   : > { %v2502_v44 = vsel %vm241_vm0, %v2499_v42, 0.0 }
0x1bea   : > { %2503 = vadd.xlane.f32.xlu0 %v2502_v44 }
0x1beb   : > { %3165 = vmatpush3.bf16.msra.mxu1 %v3164_v58 }
0x1bec   : > { %3166 = vmatprep.subr.bf16.mxu1 %v3257_v2 }
0x1bef   : > { %3168 = vmatpush3.bf16.msra.mxu1 %v3167_v60 }
0x1bf0   : > { %3169 = vmatprep.subr.bf16.mxu1 %v3257_v2  ;;  %v2500_v2 = vld [vmem:[%s4059_s4 + $0x20] ss:$0 sm:$0xff] }
0x1bf3   : > { %3171 = vmatpush3.bf16.msra.mxu1 %v3170_v63 }
0x1c77   : > { %v2504_v45 = vpop.xlane.xlu0 %2503 }
0x1c78   : > { %v2505_v46 = vmul.f32 0.015625, %v2504_v45 }
0x1c7a   : > { %v2506_v47 = vsub.f32 %v2499_v42, %v2505_v46 }
0x1c7c   : > { %v2507_v50 = vmul.f32 %v2506_v47, %v2506_v47 }
0x1c7e   : > { %v2508_v51 = vsel %vm241_vm0, %v2507_v50, 0.0 }
0x1c7f   : > { %2509 = vadd.xlane.f32.xlu1 %v2508_v51 }
0x1d0c   : > { %v2510_v52 = vpop.xlane.xlu1 %2509 }
0x1d0d   : > { %v2511_v1 = vmul.f32 0.015625, %v2510_v52 }
0x1d0f   : > { %v2512_v3 = vadd.f32 1e-05, %v2511_v1 }
0x1d11   : > { %3238 = vrsqrt.f32 %v2512_v3 }
0x1d1b   : > { %v3239_v4 = vpop.eup %3238 }
0x1d1c   : > { %v2514_v5 = vmul.f32 %v3239_v4, %v2506_v47 }
0x1d1e   : > { %v2515_v8 = vmul.f32 %v2514_v5, %v2500_v2 }
0x1d20   : > { %v2516_v9 = vadd.f32 %v2515_v8, %v2501_v6 }
0x1d22   : > { %3006 = vmatmul.mubr.msk.f32.vlgmr.msra.gmra.mrb[34].mxu1 %vm241_vm0, %v2516_v9 }
0x1df5   : > { %v2595_v10 = vpop.f32.mrb[34].mxu1 }
0x1df6   : > { %v2596_v11 = vadd.f32 %v2595_v10, %v2525_v53  ;;  %v3007_v12 = vpop.f32.mrb[35].mxu1 }
0x1df8   : > { %2599 = vst [vmem:[%s236_s30] sm:$0xff] %v2596_v11 }
0x1df9 PF: > { %s15_s18 = sadd.s32 1, %s3246_s18  }
0x1dfa   : > { %p12_p4 = scmp.ge.s32.totalorder %s15_s18, 4  }
0x1dfc   :  { %14 = sbr.rel (!%p12_p4) target bundleno = 1 (0x1), region = 78 }

</bundles_post_ra>
